<compile_context>
chip_gen: v7x
topology: tpu7x:2x2x1
jax: 0.10.0
libtpu: 0.0.40
codegen_flags: <defaults>
</compile_context>

<pallas_src>
import functools
import math

import jax
import jax.numpy as jnp
from jax.experimental import pallas as pl
from jax.experimental.pallas import tpu as pltpu

LANE = 128


def _round_up(n, m):
    return ((n + m - 1) // m) * m


def _pick_block_n(N, T, target_rows=512):
    """Largest divisor of N with bn*T ~ target_rows, but >=2 grid steps if N>=2
    so the 'parallel' batch axis can shard across v7x's two TensorCores."""
    bn = max(1, min(N, max(1, target_rows // max(T, 1))))
    while N % bn != 0:
        bn -= 1
    if N >= 2 and bn == N:
        bn = N // 2
        while N % bn != 0:
            bn -= 1
    return bn


def _slab_layernorm(t, gamma, beta, inv_cnt, eps, d_real):
    """LayerNorm over the full (T, d) slab of each example (biased variance).

    Two-pass: mean first, then sum of centered squares (no E[x^2]-mean^2
    cancellation).  `t` is (bn, T, dp) with zeros in padded lanes, so the mean
    sum is exact; centered values in padded lanes are masked to 0 so the
    variance is exact and the result stays exactly 0 in padded lanes
    (gamma/beta are also 0 there).
    """
    bn, T, dp = t.shape
    s = jnp.sum(jnp.sum(t, axis=2, keepdims=True), axis=1, keepdims=True)
    mean = s * inv_cnt                                           # (bn, 1, 1)
    diff = t - mean
    if d_real != dp:
        lane = jax.lax.broadcasted_iota(jnp.int32, (1, 1, dp), 2)
        diff = jnp.where(lane < d_real, diff, 0.0)
    sq = jnp.sum(jnp.sum(diff * diff, axis=2, keepdims=True), axis=1,
                 keepdims=True)
    var = sq * inv_cnt
    n = diff * jax.lax.rsqrt(var + eps)                          # EUP rsqrt
    return gamma * n + beta


def _transformer_block_kernel(
    x_ref,
    wqkv_ref, bqkv_ref,
    g1_ref, be1_ref,
    w1_ref, bb1_ref,
    w2_ref, bb2_ref,
    g2_ref, be2_ref,
    o_ref,
    *,
    d_real: int,
):
    eps = 1e-8
    bn, T, dp = x_ref.shape
    inv_cnt = 1.0 / float(T * d_real)                 # real slab element count

    x = x_ref[...].astype(jnp.float32)                # (bn, T, dp); padded lanes = 0
    x2 = x.reshape(bn * T, dp)
    xb = x2.astype(jnp.bfloat16)

    # ---------------- fused QKV projection (bf16 MXU, f32 accumulation) ------
    # 1/sqrt(d) is folded into WQ/bQ at parameter-prep time.
    qkv = (jnp.dot(xb, wqkv_ref[...], preferred_element_type=jnp.float32)
           + bqkv_ref[...])                            # (bn*T, 3*dp)
    q = qkv[:, :dp]
    k = qkv[:, dp:2 * dp]
    v = qkv[:, 2 * dp:]

    qb = q.astype(jnp.bfloat16).reshape(bn, T, dp)
    kb = k.astype(jnp.bfloat16).reshape(bn, T, dp)
    vb = v.astype(jnp.bfloat16).reshape(bn, T, dp)

    # ---------------- per-example attention (no explicit K transpose) --------
    scores = jnp.einsum('ntd,nsd->nts', qb, kb,
                        preferred_element_type=jnp.float32)       # (bn, T, T)
    scores = scores - jnp.max(scores, axis=-1, keepdims=True)
    p = jnp.exp(scores)
    attn = p * pl.reciprocal(jnp.sum(p, axis=-1, keepdims=True), approx=False)
    attended = jnp.einsum('nts,nsd->ntd', attn.astype(jnp.bfloat16), vb,
                          preferred_element_type=jnp.float32)     # (bn, T, dp)

    # TODO(synk): nn.Dropout(0.1) treated as identity (inference semantics).
    h = attended + x                                  # padded lanes stay exactly 0

    # ---------------- LayerNorm 1 (full (T,d) slab per example) --------------
    y = _slab_layernorm(h, g1_ref[...], be1_ref[...], inv_cnt, eps, d_real)

    # ---------------- feed-forward (bf16 MXU, f32 accumulation) --------------
    yb = y.reshape(bn * T, dp).astype(jnp.bfloat16)
    f = jnp.maximum(
        jnp.dot(yb, w1_ref[...], preferred_element_type=jnp.float32) + bb1_ref[...],
        0.0)
    f2 = jnp.dot(f.astype(jnp.bfloat16), w2_ref[...],
                 preferred_element_type=jnp.float32) + bb2_ref[...]

    z = f2.reshape(bn, T, dp) + y

    # ---------------- LayerNorm 2 --------------------------------------------
    out = _slab_layernorm(z, g2_ref[...], be2_ref[...], inv_cnt, eps, d_real)

    o_ref[...] = out.astype(o_ref.dtype)              # lane-dense (last dim = dp)


def prepare_params(params, input_dim):
    """One-time parameter prep: pad to a lane multiple, fuse QKV, fold the
    1/sqrt(d) attention scale into WQ/bQ, cast matmul weights to bf16."""
    (wq, bq, wk, bk, wv, bv, g1, be1, w1, bb1, w2, bb2, g2, be2) = params
    d = input_dim
    dp = _round_up(d, LANE)
    pad = dp - d
    inv_sqrt_d = 1.0 / math.sqrt(float(d))

    def pad_last(a):
        if pad == 0:
            return a
        widths = [(0, 0)] * (a.ndim - 1) + [(0, pad)]
        return jnp.pad(a, widths)

    def pad_w(w):
        if pad:
            w = jnp.pad(w, ((0, pad), (0, pad)))
        return w

    wq = wq * inv_sqrt_d                               # fold attention scale
    bq = bq * inv_sqrt_d

    wqkv = jnp.concatenate([pad_w(wq), pad_w(wk), pad_w(wv)],
                           axis=1).astype(jnp.bfloat16)            # (dp, 3*dp)
    bqkv = jnp.concatenate([pad_last(bq), pad_last(bk), pad_last(bv)],
                           axis=1).astype(jnp.float32)             # (1, 3*dp)

    w1p = pad_w(w1).astype(jnp.bfloat16)
    w2p = pad_w(w2).astype(jnp.bfloat16)
    b1p = pad_last(bb1).astype(jnp.float32)
    b2p = pad_last(bb2).astype(jnp.float32)
    g1p, be1p, g2p, be2p = (pad_last(a).astype(jnp.float32)
                            for a in (g1, be1, g2, be2))

    return (wqkv, bqkv, g1p, be1p, w1p, b1p, w2p, b2p, g2p, be2p)


def transformer_block(x, prepared, *, block_n=None, buffered_weights=True):
    """x: (N, T, d) float32. prepared: output of prepare_params()."""
    (wqkv, bqkv, g1, be1, w1, b1, w2, b2, g2, be2) = prepared
    N, T, d = x.shape
    dp = g1.shape[-1]
    pad = dp - d

    xp = x if pad == 0 else jnp.pad(x, ((0, 0), (0, 0), (0, pad)))

    if block_n is None:
        block_n = _pick_block_n(N, T)
    grid = (N // block_n,)

    # Grid-invariant operands: constant index_map -> single-buffer (halves
    # their VMEM footprint; buys headroom for a larger block_n).
    const_kw = dict(pipeline_mode=pl.Buffered(1)) if buffered_weights else {}

    x_spec = pl.BlockSpec((block_n, T, dp), lambda i: (i, 0, 0))
    wqkv_spec = pl.BlockSpec((dp, 3 * dp), lambda i: (0, 0), **const_kw)
    bqkv_spec = pl.BlockSpec((1, 3 * dp), lambda i: (0, 0), **const_kw)
    w_spec = pl.BlockSpec((dp, dp), lambda i: (0, 0), **const_kw)
    b_spec = pl.BlockSpec((1, dp), lambda i: (0, 0), **const_kw)
    td_spec = pl.BlockSpec((T, dp), lambda i: (0, 0), **const_kw)

    kernel = functools.partial(_transformer_block_kernel, d_real=d)

    out_p = pl.pallas_call(
        kernel,
        out_shape=jax.ShapeDtypeStruct((N, T, dp), x.dtype),
        grid=grid,
        in_specs=[
            x_spec,
            wqkv_spec, bqkv_spec,  # fused QKV weight + bias
            td_spec, td_spec,      # gamma1, beta1
            w_spec, b_spec,        # fc1
            w_spec, b_spec,        # fc2
            td_spec, td_spec,      # gamma2, beta2
        ],
        out_specs=pl.BlockSpec((block_n, T, dp), lambda i: (i, 0, 0)),
        compiler_params=pltpu.CompilerParams(
            dimension_semantics=("parallel",),
            vmem_limit_bytes=48 * 1024 * 1024,
        ),
    )(xp, wqkv, bqkv, g1, be1, w1, b1, w2, b2, g2, be2)

    # TODO(synk): when pad>0 this writes dp-wide output then slices (extra HBM
    # bytes); emit an unpadded / bf16 output if the consumer allows it.
    return out_p[:, :, :d] if pad else out_p


def init_params(key, max_len, input_dim):
    """Deterministic parameter init. Linear weights stored as (in, out) so the
    kernel does x @ W directly (equivalent to PyTorch x @ W.T with W (out,in))."""
    ks = jax.random.split(key, 10)
    scale = 1.0 / jnp.sqrt(jnp.float32(input_dim))

    def lin(kw, kb):
        w = jax.random.uniform(kw, (input_dim, input_dim), jnp.float32, -scale, scale)
        b = jax.random.uniform(kb, (1, input_dim), jnp.float32, -scale, scale)
        return w, b

    wq, bq = lin(ks[0], ks[1])
    wk, bk = lin(ks[2], ks[3])
    wv, bv = lin(ks[4], ks[5])
    w1, bb1 = lin(ks[6], ks[7])
    w2, bb2 = lin(ks[8], ks[9])

    gamma1 = jnp.ones((max_len, input_dim), jnp.float32)
    beta1 = jnp.zeros((max_len, input_dim), jnp.float32)
    gamma2 = jnp.ones((max_len, input_dim), jnp.float32)
    beta2 = jnp.zeros((max_len, input_dim), jnp.float32)

    return (wq, bq, wk, bk, wv, bv,
            gamma1, beta1,
            w1, bb1, w2, bb2,
            gamma2, beta2)


def reference_forward(x, params):
    """Pure-JAX f32 reference of the PyTorch forward (dropout in eval mode)."""
    (wq, bq, wk, bk, wv, bv, g1, be1, w1, bb1, w2, bb2, g2, be2) = params
    N, T, d = x.shape
    eps = 1e-8

    q = x @ wq + bq
    k = x @ wk + bk
    v = x @ wv + bv
    scores = jnp.einsum("ntd,nsd->nts", q, k) / jnp.sqrt(jnp.float32(d))
    attn = jax.nn.softmax(scores, axis=-1)
    attended = jnp.einsum("nts,nsd->ntd", attn, v)

    def layernorm_full(t, gamma, beta):
        flat = t.reshape(N, -1)
        mean = jnp.mean(flat, axis=1, keepdims=True)
        var = jnp.mean((flat - mean) ** 2, axis=1, keepdims=True)
        norm = ((flat - mean) / jnp.sqrt(var + eps)).reshape(N, T, d)
        return gamma * norm + beta

    y = layernorm_full(attended + x, g1, be1)
    out = jnp.maximum(y @ w1 + bb1, 0.0) @ w2 + bb2
    return layernorm_full(out + y, g2, be2)


if __name__ == "__main__":
    N, T, D = 2, 8, 32   # batch, max_len (seq), input_dim
    key = jax.random.PRNGKey(0)
    kx, kp = jax.random.split(key)

    x = jax.random.normal(kx, (N, T, D), jnp.float32)
    params = init_params(kp, T, D)
    prepared = prepare_params(params, D)   # one-time weight prep (pad/fuse/bf16)

    try:
        out = transformer_block(x, prepared)
        out = jax.block_until_ready(out)
    except Exception:
        # TODO(synk): pl.Buffered(1) single-buffering not supported on this
        # build; retry with default double-buffered constant operands.
        out = transformer_block(x, prepared, buffered_weights=False)
        out = jax.block_until_ready(out)

    ref = reference_forward(x, params)
    assert out.shape == (N, T, D)
    # bf16 MXU operands loosen accuracy vs the f32 reference.
    assert jnp.allclose(out, ref, atol=5e-2, rtol=5e-2), (
        float(jnp.max(jnp.abs(out - ref)))
    )
    print("KERNEL_OK")
</pallas_src>

<mosaic_0001>
module attributes {stable_mosaic.version = 11 : i64} {
  func.func @_transformer_block_kernel(%arg0: i32, %arg1: memref<1x8x128xf32, #tpu.memory_space<vmem>>, %arg2: memref<128x384xbf16, #tpu.memory_space<vmem>>, %arg3: memref<1x384xf32, #tpu.memory_space<vmem>>, %arg4: memref<8x128xf32, #tpu.memory_space<vmem>>, %arg5: memref<8x128xf32, #tpu.memory_space<vmem>>, %arg6: memref<128x128xbf16, #tpu.memory_space<vmem>>, %arg7: memref<1x128xf32, #tpu.memory_space<vmem>>, %arg8: memref<128x128xbf16, #tpu.memory_space<vmem>>, %arg9: memref<1x128xf32, #tpu.memory_space<vmem>>, %arg10: memref<8x128xf32, #tpu.memory_space<vmem>>, %arg11: memref<8x128xf32, #tpu.memory_space<vmem>>, %arg12: memref<1x8x128xf32, #tpu.memory_space<vmem>>) attributes {dimension_semantics = [#tpu.dimension_semantics<parallel>], iteration_bounds = array<i64: 2>, scalar_prefetch = 0 : i64, scratch_operands = 0 : i64, tpu.core_type = #tpu.core_type<tc>, window_params = [{transform_indices = @transform_0, window_bounds = array<i64: 1, 8, 128>}, {pipeline_mode = #tpu.pipeline_mode<synchronous>, transform_indices = @transform_1, window_bounds = array<i64: 128, 384>}, {pipeline_mode = #tpu.pipeline_mode<synchronous>, transform_indices = @transform_2, window_bounds = array<i64: 1, 384>}, {pipeline_mode = #tpu.pipeline_mode<synchronous>, transform_indices = @transform_3, window_bounds = array<i64: 8, 128>}, {pipeline_mode = #tpu.pipeline_mode<synchronous>, transform_indices = @transform_4, window_bounds = array<i64: 8, 128>}, {pipeline_mode = #tpu.pipeline_mode<synchronous>, transform_indices = @transform_5, window_bounds = array<i64: 128, 128>}, {pipeline_mode = #tpu.pipeline_mode<synchronous>, transform_indices = @transform_6, window_bounds = array<i64: 1, 128>}, {pipeline_mode = #tpu.pipeline_mode<synchronous>, transform_indices = @transform_7, window_bounds = array<i64: 128, 128>}, {pipeline_mode = #tpu.pipeline_mode<synchronous>, transform_indices = @transform_8, window_bounds = array<i64: 1, 128>}, {pipeline_mode = #tpu.pipeline_mode<synchronous>, transform_indices = @transform_9, window_bounds = array<i64: 8, 128>}, {pipeline_mode = #tpu.pipeline_mode<synchronous>, transform_indices = @transform_10, window_bounds = array<i64: 8, 128>}, {transform_indices = @transform_11, window_bounds = array<i64: 1, 8, 128>}]} {
    %c0 = arith.constant 0 : index
    %c0_0 = arith.constant 0 : index
    %c0_1 = arith.constant 0 : index
    %0 = vector.load %arg1[%c0, %c0_0, %c0_1] : memref<1x8x128xf32, #tpu.memory_space<vmem>>, vector<1x8x128xf32>
    %1 = vector.shape_cast %0 : vector<1x8x128xf32> to vector<8x128xf32>
    %2 = arith.truncf %1 : vector<8x128xf32> to vector<8x128xbf16>
    %c0_2 = arith.constant 0 : index
    %c0_3 = arith.constant 0 : index
    %3 = vector.load %arg2[%c0_2, %c0_3] : memref<128x384xbf16, #tpu.memory_space<vmem>>, vector<128x384xbf16>
    %cst = arith.constant dense<0.000000e+00> : vector<8x384xf32>
    %4 = tpu.matmul %2, %3, %cst {dimension_numbers = #tpu.dot_dimension_numbers<[1], [0], [0], [1], [0, 0, 1, 1], [], []>} : vector<8x128xbf16>, vector<128x384xbf16>, vector<8x384xf32> -> vector<8x384xf32>
    %c0_4 = arith.constant 0 : index
    %c0_5 = arith.constant 0 : index
    %5 = vector.load %arg3[%c0_4, %c0_5] : memref<1x384xf32, #tpu.memory_space<vmem>>, vector<1x384xf32>
    %6 = vector.broadcast %5 : vector<1x384xf32> to vector<8x384xf32>
    %7 = arith.addf %4, %6 : vector<8x384xf32>
    %8 = vector.extract_strided_slice %7 {offsets = [0, 0], sizes = [8, 128], strides = [1, 1]} : vector<8x384xf32> to vector<8x128xf32>
    %9 = vector.extract_strided_slice %7 {offsets = [0, 128], sizes = [8, 128], strides = [1, 1]} : vector<8x384xf32> to vector<8x128xf32>
    %10 = vector.extract_strided_slice %7 {offsets = [0, 256], sizes = [8, 128], strides = [1, 1]} : vector<8x384xf32> to vector<8x128xf32>
    %11 = arith.truncf %8 : vector<8x128xf32> to vector<8x128xbf16>
    %12 = vector.shape_cast %11 : vector<8x128xbf16> to vector<1x8x128xbf16>
    %13 = arith.truncf %9 : vector<8x128xf32> to vector<8x128xbf16>
    %14 = vector.shape_cast %13 : vector<8x128xbf16> to vector<1x8x128xbf16>
    %15 = arith.truncf %10 : vector<8x128xf32> to vector<8x128xbf16>
    %16 = vector.shape_cast %15 : vector<8x128xbf16> to vector<1x8x128xbf16>
    "tpu.trace_start"() <{level = 10 : i32, message = "ntd,nsd->nts"}> : () -> ()
    %cst_6 = arith.constant dense<0.000000e+00> : vector<1x8x8xf32>
    %17 = tpu.matmul %12, %14, %cst_6 {dimension_numbers = #tpu.dot_dimension_numbers<[2], [2], [1], [1], [0, 0, 0, 1, 1, 1], [0], [0]>} : vector<1x8x128xbf16>, vector<1x8x128xbf16>, vector<1x8x8xf32> -> vector<1x8x8xf32>
    "tpu.trace_stop"() : () -> ()
    %cst_7 = arith.constant dense<0xFF800000> : vector<1x8xf32>
    %18 = vector.multi_reduction <maximumf>, %17, %cst_7 [2] : vector<1x8x8xf32> to vector<1x8xf32>
    %19 = vector.shape_cast %18 : vector<1x8xf32> to vector<1x8x1xf32>
    %20 = vector.broadcast %19 : vector<1x8x1xf32> to vector<1x8x8xf32>
    %21 = arith.subf %17, %20 : vector<1x8x8xf32>
    %22 = math.exp %21 : vector<1x8x8xf32>
    %cst_8 = arith.constant dense<0.000000e+00> : vector<1x8xf32>
    %23 = vector.multi_reduction <add>, %22, %cst_8 [2] : vector<1x8x8xf32> to vector<1x8xf32>
    %24 = vector.shape_cast %23 : vector<1x8xf32> to vector<1x8x1xf32>
    %25 = tpu.reciprocal %24 : vector<1x8x1xf32> -> vector<1x8x1xf32>
    %26 = vector.broadcast %25 : vector<1x8x1xf32> to vector<1x8x8xf32>
    %27 = arith.mulf %22, %26 : vector<1x8x8xf32>
    %28 = arith.truncf %27 : vector<1x8x8xf32> to vector<1x8x8xbf16>
    "tpu.trace_start"() <{level = 10 : i32, message = "nts,nsd->ntd"}> : () -> ()
    %cst_9 = arith.constant dense<0.000000e+00> : vector<1x8x128xf32>
    %29 = tpu.matmul %28, %16, %cst_9 {dimension_numbers = #tpu.dot_dimension_numbers<[2], [1], [1], [2], [0, 0, 0, 1, 1, 2], [0], [0]>} : vector<1x8x8xbf16>, vector<1x8x128xbf16>, vector<1x8x128xf32> -> vector<1x8x128xf32>
    "tpu.trace_stop"() : () -> ()
    %30 = arith.addf %29, %0 : vector<1x8x128xf32>
    %c0_10 = arith.constant 0 : index
    %c0_11 = arith.constant 0 : index
    %31 = vector.load %arg4[%c0_10, %c0_11] : memref<8x128xf32, #tpu.memory_space<vmem>>, vector<8x128xf32>
    %c0_12 = arith.constant 0 : index
    %c0_13 = arith.constant 0 : index
    %32 = vector.load %arg5[%c0_12, %c0_13] : memref<8x128xf32, #tpu.memory_space<vmem>>, vector<8x128xf32>
    %cst_14 = arith.constant dense<0.000000e+00> : vector<1x8xf32>
    %33 = vector.multi_reduction <add>, %30, %cst_14 [2] : vector<1x8x128xf32> to vector<1x8xf32>
    %34 = vector.shape_cast %33 : vector<1x8xf32> to vector<1x8x1xf32>
    %cst_15 = arith.constant dense<0.000000e+00> : vector<1x1xf32>
    %35 = vector.multi_reduction <add>, %34, %cst_15 [1] : vector<1x8x1xf32> to vector<1x1xf32>
    %36 = vector.shape_cast %35 : vector<1x1xf32> to vector<1x1x1xf32>
    %cst_16 = arith.constant 3.906250e-03 : f32
    %37 = vector.broadcast %cst_16 : f32 to vector<1x1x1xf32>
    %38 = arith.mulf %36, %37 : vector<1x1x1xf32>
    %39 = vector.broadcast %38 : vector<1x1x1xf32> to vector<1x8x128xf32>
    %40 = arith.subf %30, %39 : vector<1x8x128xf32>
    %41 = tpu.iota {dimensions = array<i32: 2>} : vector<1x1x128xi32>
    %c32_i32 = arith.constant 32 : i32
    %42 = vector.broadcast %c32_i32 : i32 to vector<1x1x128xi32>
    %43 = arith.cmpi slt, %41, %42 : vector<1x1x128xi32>
    %cst_17 = arith.constant 0.000000e+00 : f32
    %44 = vector.shape_cast %43 : vector<1x1x128xi1> to vector<1x1x128xi1>
    %45 = vector.broadcast %44 : vector<1x1x128xi1> to vector<1x8x128xi1>
    %46 = vector.broadcast %cst_17 : f32 to vector<1x8x128xf32>
    %47 = arith.select %45, %40, %46 : vector<1x8x128xi1>, vector<1x8x128xf32>
    %48 = arith.mulf %47, %47 : vector<1x8x128xf32>
    %cst_18 = arith.constant dense<0.000000e+00> : vector<1x8xf32>
    %49 = vector.multi_reduction <add>, %48, %cst_18 [2] : vector<1x8x128xf32> to vector<1x8xf32>
    %50 = vector.shape_cast %49 : vector<1x8xf32> to vector<1x8x1xf32>
    %cst_19 = arith.constant dense<0.000000e+00> : vector<1x1xf32>
    %51 = vector.multi_reduction <add>, %50, %cst_19 [1] : vector<1x8x1xf32> to vector<1x1xf32>
    %52 = vector.shape_cast %51 : vector<1x1xf32> to vector<1x1x1xf32>
    %cst_20 = arith.constant 3.906250e-03 : f32
    %53 = vector.broadcast %cst_20 : f32 to vector<1x1x1xf32>
    %54 = arith.mulf %52, %53 : vector<1x1x1xf32>
    %cst_21 = arith.constant 9.99999993E-9 : f32
    %55 = vector.broadcast %cst_21 : f32 to vector<1x1x1xf32>
    %56 = arith.addf %54, %55 : vector<1x1x1xf32>
    %57 = math.rsqrt %56 : vector<1x1x1xf32>
    %58 = vector.broadcast %57 : vector<1x1x1xf32> to vector<1x8x128xf32>
    %59 = arith.mulf %47, %58 : vector<1x8x128xf32>
    %60 = vector.shape_cast %31 : vector<8x128xf32> to vector<1x8x128xf32>
    %61 = arith.mulf %60, %59 : vector<1x8x128xf32>
    %62 = vector.shape_cast %32 : vector<8x128xf32> to vector<1x8x128xf32>
    %63 = arith.addf %61, %62 : vector<1x8x128xf32>
    %64 = vector.shape_cast %63 : vector<1x8x128xf32> to vector<8x128xf32>
    %65 = arith.truncf %64 : vector<8x128xf32> to vector<8x128xbf16>
    %c0_22 = arith.constant 0 : index
    %c0_23 = arith.constant 0 : index
    %66 = vector.load %arg6[%c0_22, %c0_23] : memref<128x128xbf16, #tpu.memory_space<vmem>>, vector<128x128xbf16>
    %cst_24 = arith.constant dense<0.000000e+00> : vector<8x128xf32>
    %67 = tpu.matmul %65, %66, %cst_24 {dimension_numbers = #tpu.dot_dimension_numbers<[1], [0], [0], [1], [0, 0, 1, 1], [], []>} : vector<8x128xbf16>, vector<128x128xbf16>, vector<8x128xf32> -> vector<8x128xf32>
    %c0_25 = arith.constant 0 : index
    %c0_26 = arith.constant 0 : index
    %68 = vector.load %arg7[%c0_25, %c0_26] : memref<1x128xf32, #tpu.memory_space<vmem>>, vector<1x128xf32>
    %69 = vector.broadcast %68 : vector<1x128xf32> to vector<8x128xf32>
    %70 = arith.addf %67, %69 : vector<8x128xf32>
    %cst_27 = arith.constant 0.000000e+00 : f32
    %71 = vector.broadcast %cst_27 : f32 to vector<8x128xf32>
    %72 = arith.maximumf %70, %71 : vector<8x128xf32>
    %73 = arith.truncf %72 : vector<8x128xf32> to vector<8x128xbf16>
    %c0_28 = arith.constant 0 : index
    %c0_29 = arith.constant 0 : index
    %74 = vector.load %arg8[%c0_28, %c0_29] : memref<128x128xbf16, #tpu.memory_space<vmem>>, vector<128x128xbf16>
    %cst_30 = arith.constant dense<0.000000e+00> : vector<8x128xf32>
    %75 = tpu.matmul %73, %74, %cst_30 {dimension_numbers = #tpu.dot_dimension_numbers<[1], [0], [0], [1], [0, 0, 1, 1], [], []>} : vector<8x128xbf16>, vector<128x128xbf16>, vector<8x128xf32> -> vector<8x128xf32>
    %c0_31 = arith.constant 0 : index
    %c0_32 = arith.constant 0 : index
    %76 = vector.load %arg9[%c0_31, %c0_32] : memref<1x128xf32, #tpu.memory_space<vmem>>, vector<1x128xf32>
    %77 = vector.broadcast %76 : vector<1x128xf32> to vector<8x128xf32>
    %78 = arith.addf %75, %77 : vector<8x128xf32>
    %79 = vector.shape_cast %78 : vector<8x128xf32> to vector<1x8x128xf32>
    %80 = arith.addf %79, %63 : vector<1x8x128xf32>
    %c0_33 = arith.constant 0 : index
    %c0_34 = arith.constant 0 : index
    %81 = vector.load %arg10[%c0_33, %c0_34] : memref<8x128xf32, #tpu.memory_space<vmem>>, vector<8x128xf32>
    %c0_35 = arith.constant 0 : index
    %c0_36 = arith.constant 0 : index
    %82 = vector.load %arg11[%c0_35, %c0_36] : memref<8x128xf32, #tpu.memory_space<vmem>>, vector<8x128xf32>
    %cst_37 = arith.constant dense<0.000000e+00> : vector<1x8xf32>
    %83 = vector.multi_reduction <add>, %80, %cst_37 [2] : vector<1x8x128xf32> to vector<1x8xf32>
    %84 = vector.shape_cast %83 : vector<1x8xf32> to vector<1x8x1xf32>
    %cst_38 = arith.constant dense<0.000000e+00> : vector<1x1xf32>
    %85 = vector.multi_reduction <add>, %84, %cst_38 [1] : vector<1x8x1xf32> to vector<1x1xf32>
    %86 = vector.shape_cast %85 : vector<1x1xf32> to vector<1x1x1xf32>
    %cst_39 = arith.constant 3.906250e-03 : f32
    %87 = vector.broadcast %cst_39 : f32 to vector<1x1x1xf32>
    %88 = arith.mulf %86, %87 : vector<1x1x1xf32>
    %89 = vector.broadcast %88 : vector<1x1x1xf32> to vector<1x8x128xf32>
    %90 = arith.subf %80, %89 : vector<1x8x128xf32>
    %91 = tpu.iota {dimensions = array<i32: 2>} : vector<1x1x128xi32>
    %c32_i32_40 = arith.constant 32 : i32
    %92 = vector.broadcast %c32_i32_40 : i32 to vector<1x1x128xi32>
    %93 = arith.cmpi slt, %91, %92 : vector<1x1x128xi32>
    %cst_41 = arith.constant 0.000000e+00 : f32
    %94 = vector.shape_cast %93 : vector<1x1x128xi1> to vector<1x1x128xi1>
    %95 = vector.broadcast %94 : vector<1x1x128xi1> to vector<1x8x128xi1>
    %96 = vector.broadcast %cst_41 : f32 to vector<1x8x128xf32>
    %97 = arith.select %95, %90, %96 : vector<1x8x128xi1>, vector<1x8x128xf32>
    %98 = arith.mulf %97, %97 : vector<1x8x128xf32>
    %cst_42 = arith.constant dense<0.000000e+00> : vector<1x8xf32>
    %99 = vector.multi_reduction <add>, %98, %cst_42 [2] : vector<1x8x128xf32> to vector<1x8xf32>
    %100 = vector.shape_cast %99 : vector<1x8xf32> to vector<1x8x1xf32>
    %cst_43 = arith.constant dense<0.000000e+00> : vector<1x1xf32>
    %101 = vector.multi_reduction <add>, %100, %cst_43 [1] : vector<1x8x1xf32> to vector<1x1xf32>
    %102 = vector.shape_cast %101 : vector<1x1xf32> to vector<1x1x1xf32>
    %cst_44 = arith.constant 3.906250e-03 : f32
    %103 = vector.broadcast %cst_44 : f32 to vector<1x1x1xf32>
    %104 = arith.mulf %102, %103 : vector<1x1x1xf32>
    %cst_45 = arith.constant 9.99999993E-9 : f32
    %105 = vector.broadcast %cst_45 : f32 to vector<1x1x1xf32>
    %106 = arith.addf %104, %105 : vector<1x1x1xf32>
    %107 = math.rsqrt %106 : vector<1x1x1xf32>
    %108 = vector.broadcast %107 : vector<1x1x1xf32> to vector<1x8x128xf32>
    %109 = arith.mulf %97, %108 : vector<1x8x128xf32>
    %110 = vector.shape_cast %81 : vector<8x128xf32> to vector<1x8x128xf32>
    %111 = arith.mulf %110, %109 : vector<1x8x128xf32>
    %112 = vector.shape_cast %82 : vector<8x128xf32> to vector<1x8x128xf32>
    %113 = arith.addf %111, %112 : vector<1x8x128xf32>
    %c0_46 = arith.constant 0 : index
    %c0_47 = arith.constant 0 : index
    %c0_48 = arith.constant 0 : index
    %114 = vector.load %arg12[%c0_46, %c0_47, %c0_48] : memref<1x8x128xf32, #tpu.memory_space<vmem>>, vector<1x8x128xf32>
    tpu.vector_store %arg12[%c0_46, %c0_47, %c0_48], %113 {strides = array<i32>} : memref<1x8x128xf32, #tpu.memory_space<vmem>>, vector<1x8x128xf32>,
    return
  }
  func.func @transform_0(%arg0: i32) -> (i32, i32, i32) {
    %c0_i32 = arith.constant 0 : i32
    %c0_i32_0 = arith.constant 0 : i32
    %c0_i32_1 = arith.constant 0 : i32
    return %arg0, %c0_i32, %c0_i32_0 : i32, i32, i32
  }
  func.func @transform_1(%arg0: i32) -> (i32, i32) {
    %c0_i32 = arith.constant 0 : i32
    %c0_i32_0 = arith.constant 0 : i32
    %c0_i32_1 = arith.constant 0 : i32
    return %c0_i32, %c0_i32_0 : i32, i32
  }
  func.func @transform_2(%arg0: i32) -> (i32, i32) {
    %c0_i32 = arith.constant 0 : i32
    %c0_i32_0 = arith.constant 0 : i32
    %c0_i32_1 = arith.constant 0 : i32
    return %c0_i32, %c0_i32_0 : i32, i32
  }
  func.func @transform_3(%arg0: i32) -> (i32, i32) {
    %c0_i32 = arith.constant 0 : i32
    %c0_i32_0 = arith.constant 0 : i32
    %c0_i32_1 = arith.constant 0 : i32
    return %c0_i32, %c0_i32_0 : i32, i32
  }
  func.func @transform_4(%arg0: i32) -> (i32, i32) {
    %c0_i32 = arith.constant 0 : i32
    %c0_i32_0 = arith.constant 0 : i32
    %c0_i32_1 = arith.constant 0 : i32
    return %c0_i32, %c0_i32_0 : i32, i32
  }
  func.func @transform_5(%arg0: i32) -> (i32, i32) {
    %c0_i32 = arith.constant 0 : i32
    %c0_i32_0 = arith.constant 0 : i32
    %c0_i32_1 = arith.constant 0 : i32
    return %c0_i32, %c0_i32_0 : i32, i32
  }
  func.func @transform_6(%arg0: i32) -> (i32, i32) {
    %c0_i32 = arith.constant 0 : i32
    %c0_i32_0 = arith.constant 0 : i32
    %c0_i32_1 = arith.constant 0 : i32
    return %c0_i32, %c0_i32_0 : i32, i32
  }
  func.func @transform_7(%arg0: i32) -> (i32, i32) {
    %c0_i32 = arith.constant 0 : i32
    %c0_i32_0 = arith.constant 0 : i32
    %c0_i32_1 = arith.constant 0 : i32
    return %c0_i32, %c0_i32_0 : i32, i32
  }
  func.func @transform_8(%arg0: i32) -> (i32, i32) {
    %c0_i32 = arith.constant 0 : i32
    %c0_i32_0 = arith.constant 0 : i32
    %c0_i32_1 = arith.constant 0 : i32
    return %c0_i32, %c0_i32_0 : i32, i32
  }
  func.func @transform_9(%arg0: i32) -> (i32, i32) {
    %c0_i32 = arith.constant 0 : i32
    %c0_i32_0 = arith.constant 0 : i32
    %c0_i32_1 = arith.constant 0 : i32
    return %c0_i32, %c0_i32_0 : i32, i32
  }
  func.func @transform_10(%arg0: i32) -> (i32, i32) {
    %c0_i32 = arith.constant 0 : i32
    %c0_i32_0 = arith.constant 0 : i32
    %c0_i32_1 = arith.constant 0 : i32
    return %c0_i32, %c0_i32_0 : i32, i32
  }
  func.func @transform_11(%arg0: i32) -> (i32, i32, i32) {
    %c0_i32 = arith.constant 0 : i32
    %c0_i32_0 = arith.constant 0 : i32
    %c0_i32_1 = arith.constant 0 : i32
    return %arg0, %c0_i32, %c0_i32_0 : i32, i32, i32
  }
}

module attributes {stable_mosaic.version = 11 : i64} {
  func.func @_transformer_block_kernel(%arg0: i32, %arg1: memref<1x8x128xf32, #tpu.memory_space<vmem>>, %arg2: memref<128x384xbf16, #tpu.memory_space<vmem>>, %arg3: memref<1x384xf32, #tpu.memory_space<vmem>>, %arg4: memref<8x128xf32, #tpu.memory_space<vmem>>, %arg5: memref<8x128xf32, #tpu.memory_space<vmem>>, %arg6: memref<128x128xbf16, #tpu.memory_space<vmem>>, %arg7: memref<1x128xf32, #tpu.memory_space<vmem>>, %arg8: memref<128x128xbf16, #tpu.memory_space<vmem>>, %arg9: memref<1x128xf32, #tpu.memory_space<vmem>>, %arg10: memref<8x128xf32, #tpu.memory_space<vmem>>, %arg11: memref<8x128xf32, #tpu.memory_space<vmem>>, %arg12: memref<1x8x128xf32, #tpu.memory_space<vmem>>) attributes {dimension_semantics = [#tpu.dimension_semantics<parallel>], iteration_bounds = array<i64: 2>, scalar_prefetch = 0 : i64, scratch_operands = 0 : i64, tpu.core_type = #tpu.core_type<tc>, window_params = [{transform_indices = @transform_0, window_bounds = array<i64: 1, 8, 128>}, {pipeline_mode = #tpu.pipeline_mode<synchronous>, transform_indices = @transform_1, window_bounds = array<i64: 128, 384>}, {pipeline_mode = #tpu.pipeline_mode<synchronous>, transform_indices = @transform_2, window_bounds = array<i64: 1, 384>}, {pipeline_mode = #tpu.pipeline_mode<synchronous>, transform_indices = @transform_3, window_bounds = array<i64: 8, 128>}, {pipeline_mode = #tpu.pipeline_mode<synchronous>, transform_indices = @transform_4, window_bounds = array<i64: 8, 128>}, {pipeline_mode = #tpu.pipeline_mode<synchronous>, transform_indices = @transform_5, window_bounds = array<i64: 128, 128>}, {pipeline_mode = #tpu.pipeline_mode<synchronous>, transform_indices = @transform_6, window_bounds = array<i64: 1, 128>}, {pipeline_mode = #tpu.pipeline_mode<synchronous>, transform_indices = @transform_7, window_bounds = array<i64: 128, 128>}, {pipeline_mode = #tpu.pipeline_mode<synchronous>, transform_indices = @transform_8, window_bounds = array<i64: 1, 128>}, {pipeline_mode = #tpu.pipeline_mode<synchronous>, transform_indices = @transform_9, window_bounds = array<i64: 8, 128>}, {pipeline_mode = #tpu.pipeline_mode<synchronous>, transform_indices = @transform_10, window_bounds = array<i64: 8, 128>}, {transform_indices = @transform_11, window_bounds = array<i64: 1, 8, 128>}]} {
    %c0 = arith.constant 0 : index
    %c0_0 = arith.constant 0 : index
    %c0_1 = arith.constant 0 : index
    %0 = vector.load %arg1[%c0, %c0_0, %c0_1] : memref<1x8x128xf32, #tpu.memory_space<vmem>>, vector<1x8x128xf32>
    %1 = vector.shape_cast %0 : vector<1x8x128xf32> to vector<8x128xf32>
    %2 = arith.truncf %1 : vector<8x128xf32> to vector<8x128xbf16>
    %c0_2 = arith.constant 0 : index
    %c0_3 = arith.constant 0 : index
    %3 = vector.load %arg2[%c0_2, %c0_3] : memref<128x384xbf16, #tpu.memory_space<vmem>>, vector<128x384xbf16>
    %cst = arith.constant dense<0.000000e+00> : vector<8x384xf32>
    %4 = tpu.matmul %2, %3, %cst {dimension_numbers = #tpu.dot_dimension_numbers<[1], [0], [0], [1], [0, 0, 1, 1], [], []>} : vector<8x128xbf16>, vector<128x384xbf16>, vector<8x384xf32> -> vector<8x384xf32>
    %c0_4 = arith.constant 0 : index
    %c0_5 = arith.constant 0 : index
    %5 = vector.load %arg3[%c0_4, %c0_5] : memref<1x384xf32, #tpu.memory_space<vmem>>, vector<1x384xf32>
    %6 = vector.broadcast %5 : vector<1x384xf32> to vector<8x384xf32>
    %7 = arith.addf %4, %6 : vector<8x384xf32>
    %8 = vector.extract_strided_slice %7 {offsets = [0, 0], sizes = [8, 128], strides = [1, 1]} : vector<8x384xf32> to vector<8x128xf32>
    %9 = vector.extract_strided_slice %7 {offsets = [0, 128], sizes = [8, 128], strides = [1, 1]} : vector<8x384xf32> to vector<8x128xf32>
    %10 = vector.extract_strided_slice %7 {offsets = [0, 256], sizes = [8, 128], strides = [1, 1]} : vector<8x384xf32> to vector<8x128xf32>
    %11 = arith.truncf %8 : vector<8x128xf32> to vector<8x128xbf16>
    %12 = vector.shape_cast %11 : vector<8x128xbf16> to vector<1x8x128xbf16>
    %13 = arith.truncf %9 : vector<8x128xf32> to vector<8x128xbf16>
    %14 = vector.shape_cast %13 : vector<8x128xbf16> to vector<1x8x128xbf16>
    %15 = arith.truncf %10 : vector<8x128xf32> to vector<8x128xbf16>
    %16 = vector.shape_cast %15 : vector<8x128xbf16> to vector<1x8x128xbf16>
    "tpu.trace_start"() <{level = 10 : i32, message = "ntd,nsd->nts"}> : () -> ()
    %cst_6 = arith.constant dense<0.000000e+00> : vector<1x8x8xf32>
    %17 = tpu.matmul %12, %14, %cst_6 {dimension_numbers = #tpu.dot_dimension_numbers<[2], [2], [1], [1], [0, 0, 0, 1, 1, 1], [0], [0]>} : vector<1x8x128xbf16>, vector<1x8x128xbf16>, vector<1x8x8xf32> -> vector<1x8x8xf32>
    "tpu.trace_stop"() : () -> ()
    %cst_7 = arith.constant dense<0xFF800000> : vector<1x8xf32>
    %18 = vector.multi_reduction <maximumf>, %17, %cst_7 [2] : vector<1x8x8xf32> to vector<1x8xf32>
    %19 = vector.shape_cast %18 : vector<1x8xf32> to vector<1x8x1xf32>
    %20 = vector.broadcast %19 : vector<1x8x1xf32> to vector<1x8x8xf32>
    %21 = arith.subf %17, %20 : vector<1x8x8xf32>
    %22 = math.exp %21 : vector<1x8x8xf32>
    %cst_8 = arith.constant dense<0.000000e+00> : vector<1x8xf32>
    %23 = vector.multi_reduction <add>, %22, %cst_8 [2] : vector<1x8x8xf32> to vector<1x8xf32>
    %24 = vector.shape_cast %23 : vector<1x8xf32> to vector<1x8x1xf32>
    %25 = tpu.reciprocal %24 : vector<1x8x1xf32> -> vector<1x8x1xf32>
    %26 = vector.broadcast %25 : vector<1x8x1xf32> to vector<1x8x8xf32>
    %27 = arith.mulf %22, %26 : vector<1x8x8xf32>
    %28 = arith.truncf %27 : vector<1x8x8xf32> to vector<1x8x8xbf16>
    "tpu.trace_start"() <{level = 10 : i32, message = "nts,nsd->ntd"}> : () -> ()
    %cst_9 = arith.constant dense<0.000000e+00> : vector<1x8x128xf32>
    %29 = tpu.matmul %28, %16, %cst_9 {dimension_numbers = #tpu.dot_dimension_numbers<[2], [1], [1], [2], [0, 0, 0, 1, 1, 2], [0], [0]>} : vector<1x8x8xbf16>, vector<1x8x128xbf16>, vector<1x8x128xf32> -> vector<1x8x128xf32>
    "tpu.trace_stop"() : () -> ()
    %30 = arith.addf %29, %0 : vector<1x8x128xf32>
    %c0_10 = arith.constant 0 : index
    %c0_11 = arith.constant 0 : index
    %31 = vector.load %arg4[%c0_10, %c0_11] : memref<8x128xf32, #tpu.memory_space<vmem>>, vector<8x128xf32>
    %c0_12 = arith.constant 0 : index
    %c0_13 = arith.constant 0 : index
    %32 = vector.load %arg5[%c0_12, %c0_13] : memref<8x128xf32, #tpu.memory_space<vmem>>, vector<8x128xf32>
    %cst_14 = arith.constant dense<0.000000e+00> : vector<1x8xf32>
    %33 = vector.multi_reduction <add>, %30, %cst_14 [2] : vector<1x8x128xf32> to vector<1x8xf32>
    %34 = vector.shape_cast %33 : vector<1x8xf32> to vector<1x8x1xf32>
    %cst_15 = arith.constant dense<0.000000e+00> : vector<1x1xf32>
    %35 = vector.multi_reduction <add>, %34, %cst_15 [1] : vector<1x8x1xf32> to vector<1x1xf32>
    %36 = vector.shape_cast %35 : vector<1x1xf32> to vector<1x1x1xf32>
    %cst_16 = arith.constant 3.906250e-03 : f32
    %37 = vector.broadcast %cst_16 : f32 to vector<1x1x1xf32>
    %38 = arith.mulf %36, %37 : vector<1x1x1xf32>
    %39 = vector.broadcast %38 : vector<1x1x1xf32> to vector<1x8x128xf32>
    %40 = arith.subf %30, %39 : vector<1x8x128xf32>
    %41 = tpu.iota {dimensions = array<i32: 2>} : vector<1x1x128xi32>
    %c32_i32 = arith.constant 32 : i32
    %42 = vector.broadcast %c32_i32 : i32 to vector<1x1x128xi32>
    %43 = arith.cmpi slt, %41, %42 : vector<1x1x128xi32>
    %cst_17 = arith.constant 0.000000e+00 : f32
    %44 = vector.shape_cast %43 : vector<1x1x128xi1> to vector<1x1x128xi1>
    %45 = vector.broadcast %44 : vector<1x1x128xi1> to vector<1x8x128xi1>
    %46 = vector.broadcast %cst_17 : f32 to vector<1x8x128xf32>
    %47 = arith.select %45, %40, %46 : vector<1x8x128xi1>, vector<1x8x128xf32>
    %48 = arith.mulf %47, %47 : vector<1x8x128xf32>
    %cst_18 = arith.constant dense<0.000000e+00> : vector<1x8xf32>
    %49 = vector.multi_reduction <add>, %48, %cst_18 [2] : vector<1x8x128xf32> to vector<1x8xf32>
    %50 = vector.shape_cast %49 : vector<1x8xf32> to vector<1x8x1xf32>
    %cst_19 = arith.constant dense<0.000000e+00> : vector<1x1xf32>
    %51 = vector.multi_reduction <add>, %50, %cst_19 [1] : vector<1x8x1xf32> to vector<1x1xf32>
    %52 = vector.shape_cast %51 : vector<1x1xf32> to vector<1x1x1xf32>
    %cst_20 = arith.constant 3.906250e-03 : f32
    %53 = vector.broadcast %cst_20 : f32 to vector<1x1x1xf32>
    %54 = arith.mulf %52, %53 : vector<1x1x1xf32>
    %cst_21 = arith.constant 9.99999993E-9 : f32
    %55 = vector.broadcast %cst_21 : f32 to vector<1x1x1xf32>
    %56 = arith.addf %54, %55 : vector<1x1x1xf32>
    %57 = math.rsqrt %56 : vector<1x1x1xf32>
    %58 = vector.broadcast %57 : vector<1x1x1xf32> to vector<1x8x128xf32>
    %59 = arith.mulf %47, %58 : vector<1x8x128xf32>
    %60 = vector.shape_cast %31 : vector<8x128xf32> to vector<1x8x128xf32>
    %61 = arith.mulf %60, %59 : vector<1x8x128xf32>
    %62 = vector.shape_cast %32 : vector<8x128xf32> to vector<1x8x128xf32>
    %63 = arith.addf %61, %62 : vector<1x8x128xf32>
    %64 = vector.shape_cast %63 : vector<1x8x128xf32> to vector<8x128xf32>
    %65 = arith.truncf %64 : vector<8x128xf32> to vector<8x128xbf16>
    %c0_22 = arith.constant 0 : index
    %c0_23 = arith.constant 0 : index
    %66 = vector.load %arg6[%c0_22, %c0_23] : memref<128x128xbf16, #tpu.memory_space<vmem>>, vector<128x128xbf16>
    %cst_24 = arith.constant dense<0.000000e+00> : vector<8x128xf32>
    %67 = tpu.matmul %65, %66, %cst_24 {dimension_numbers = #tpu.dot_dimension_numbers<[1], [0], [0], [1], [0, 0, 1, 1], [], []>} : vector<8x128xbf16>, vector<128x128xbf16>, vector<8x128xf32> -> vector<8x128xf32>
    %c0_25 = arith.constant 0 : index
    %c0_26 = arith.constant 0 : index
    %68 = vector.load %arg7[%c0_25, %c0_26] : memref<1x128xf32, #tpu.memory_space<vmem>>, vector<1x128xf32>
    %69 = vector.broadcast %68 : vector<1x128xf32> to vector<8x128xf32>
    %70 = arith.addf %67, %69 : vector<8x128xf32>
    %cst_27 = arith.constant 0.000000e+00 : f32
    %71 = vector.broadcast %cst_27 : f32 to vector<8x128xf32>
    %72 = arith.maximumf %70, %71 : vector<8x128xf32>
    %73 = arith.truncf %72 : vector<8x128xf32> to vector<8x128xbf16>
    %c0_28 = arith.constant 0 : index
    %c0_29 = arith.constant 0 : index
    %74 = vector.load %arg8[%c0_28, %c0_29] : memref<128x128xbf16, #tpu.memory_space<vmem>>, vector<128x128xbf16>
    %cst_30 = arith.constant dense<0.000000e+00> : vector<8x128xf32>
    %75 = tpu.matmul %73, %74, %cst_30 {dimension_numbers = #tpu.dot_dimension_numbers<[1], [0], [0], [1], [0, 0, 1, 1], [], []>} : vector<8x128xbf16>, vector<128x128xbf16>, vector<8x128xf32> -> vector<8x128xf32>
    %c0_31 = arith.constant 0 : index
    %c0_32 = arith.constant 0 : index
    %76 = vector.load %arg9[%c0_31, %c0_32] : memref<1x128xf32, #tpu.memory_space<vmem>>, vector<1x128xf32>
    %77 = vector.broadcast %76 : vector<1x128xf32> to vector<8x128xf32>
    %78 = arith.addf %75, %77 : vector<8x128xf32>
    %79 = vector.shape_cast %78 : vector<8x128xf32> to vector<1x8x128xf32>
    %80 = arith.addf %79, %63 : vector<1x8x128xf32>
    %c0_33 = arith.constant 0 : index
    %c0_34 = arith.constant 0 : index
    %81 = vector.load %arg10[%c0_33, %c0_34] : memref<8x128xf32, #tpu.memory_space<vmem>>, vector<8x128xf32>
    %c0_35 = arith.constant 0 : index
    %c0_36 = arith.constant 0 : index
    %82 = vector.load %arg11[%c0_35, %c0_36] : memref<8x128xf32, #tpu.memory_space<vmem>>, vector<8x128xf32>
    %cst_37 = arith.constant dense<0.000000e+00> : vector<1x8xf32>
    %83 = vector.multi_reduction <add>, %80, %cst_37 [2] : vector<1x8x128xf32> to vector<1x8xf32>
    %84 = vector.shape_cast %83 : vector<1x8xf32> to vector<1x8x1xf32>
    %cst_38 = arith.constant dense<0.000000e+00> : vector<1x1xf32>
    %85 = vector.multi_reduction <add>, %84, %cst_38 [1] : vector<1x8x1xf32> to vector<1x1xf32>
    %86 = vector.shape_cast %85 : vector<1x1xf32> to vector<1x1x1xf32>
    %cst_39 = arith.constant 3.906250e-03 : f32
    %87 = vector.broadcast %cst_39 : f32 to vector<1x1x1xf32>
    %88 = arith.mulf %86, %87 : vector<1x1x1xf32>
    %89 = vector.broadcast %88 : vector<1x1x1xf32> to vector<1x8x128xf32>
    %90 = arith.subf %80, %89 : vector<1x8x128xf32>
    %91 = tpu.iota {dimensions = array<i32: 2>} : vector<1x1x128xi32>
    %c32_i32_40 = arith.constant 32 : i32
    %92 = vector.broadcast %c32_i32_40 : i32 to vector<1x1x128xi32>
    %93 = arith.cmpi slt, %91, %92 : vector<1x1x128xi32>
    %cst_41 = arith.constant 0.000000e+00 : f32
    %94 = vector.shape_cast %93 : vector<1x1x128xi1> to vector<1x1x128xi1>
    %95 = vector.broadcast %94 : vector<1x1x128xi1> to vector<1x8x128xi1>
    %96 = vector.broadcast %cst_41 : f32 to vector<1x8x128xf32>
    %97 = arith.select %95, %90, %96 : vector<1x8x128xi1>, vector<1x8x128xf32>
    %98 = arith.mulf %97, %97 : vector<1x8x128xf32>
    %cst_42 = arith.constant dense<0.000000e+00> : vector<1x8xf32>
    %99 = vector.multi_reduction <add>, %98, %cst_42 [2] : vector<1x8x128xf32> to vector<1x8xf32>
    %100 = vector.shape_cast %99 : vector<1x8xf32> to vector<1x8x1xf32>
    %cst_43 = arith.constant dense<0.000000e+00> : vector<1x1xf32>
    %101 = vector.multi_reduction <add>, %100, %cst_43 [1] : vector<1x8x1xf32> to vector<1x1xf32>
    %102 = vector.shape_cast %101 : vector<1x1xf32> to vector<1x1x1xf32>
    %cst_44 = arith.constant 3.906250e-03 : f32
    %103 = vector.broadcast %cst_44 : f32 to vector<1x1x1xf32>
    %104 = arith.mulf %102, %103 : vector<1x1x1xf32>
    %cst_45 = arith.constant 9.99999993E-9 : f32
    %105 = vector.broadcast %cst_45 : f32 to vector<1x1x1xf32>
    %106 = arith.addf %104, %105 : vector<1x1x1xf32>
    %107 = math.rsqrt %106 : vector<1x1x1xf32>
    %108 = vector.broadcast %107 : vector<1x1x1xf32> to vector<1x8x128xf32>
    %109 = arith.mulf %97, %108 : vector<1x8x128xf32>
    %110 = vector.shape_cast %81 : vector<8x128xf32> to vector<1x8x128xf32>
    %111 = arith.mulf %110, %109 : vector<1x8x128xf32>
    %112 = vector.shape_cast %82 : vector<8x128xf32> to vector<1x8x128xf32>
    %113 = arith.addf %111, %112 : vector<1x8x128xf32>
    %c0_46 = arith.constant 0 : index
    %c0_47 = arith.constant 0 : index
    %c0_48 = arith.constant 0 : index
    %114 = vector.load %arg12[%c0_46, %c0_47, %c0_48] : memref<1x8x128xf32, #tpu.memory_space<vmem>>, vector<1x8x128xf32>
    tpu.vector_store %arg12[%c0_46, %c0_47, %c0_48], %113 {strides = array<i32>} : memref<1x8x128xf32, #tpu.memory_space<vmem>>, vector<1x8x128xf32>,
    return
  }
  func.func @transform_0(%arg0: i32) -> (i32, i32, i32) {
    %c0_i32 = arith.constant 0 : i32
    %c0_i32_0 = arith.constant 0 : i32
    %c0_i32_1 = arith.constant 0 : i32
    return %arg0, %c0_i32, %c0_i32_0 : i32, i32, i32
  }
  func.func @transform_1(%arg0: i32) -> (i32, i32) {
    %c0_i32 = arith.constant 0 : i32
    %c0_i32_0 = arith.constant 0 : i32
    %c0_i32_1 = arith.constant 0 : i32
    return %c0_i32, %c0_i32_0 : i32, i32
  }
  func.func @transform_2(%arg0: i32) -> (i32, i32) {
    %c0_i32 = arith.constant 0 : i32
    %c0_i32_0 = arith.constant 0 : i32
    %c0_i32_1 = arith.constant 0 : i32
    return %c0_i32, %c0_i32_0 : i32, i32
  }
  func.func @transform_3(%arg0: i32) -> (i32, i32) {
    %c0_i32 = arith.constant 0 : i32
    %c0_i32_0 = arith.constant 0 : i32
    %c0_i32_1 = arith.constant 0 : i32
    return %c0_i32, %c0_i32_0 : i32, i32
  }
  func.func @transform_4(%arg0: i32) -> (i32, i32) {
    %c0_i32 = arith.constant 0 : i32
    %c0_i32_0 = arith.constant 0 : i32
    %c0_i32_1 = arith.constant 0 : i32
    return %c0_i32, %c0_i32_0 : i32, i32
  }
  func.func @transform_5(%arg0: i32) -> (i32, i32) {
    %c0_i32 = arith.constant 0 : i32
    %c0_i32_0 = arith.constant 0 : i32
    %c0_i32_1 = arith.constant 0 : i32
    return %c0_i32, %c0_i32_0 : i32, i32
  }
  func.func @transform_6(%arg0: i32) -> (i32, i32) {
    %c0_i32 = arith.constant 0 : i32
    %c0_i32_0 = arith.constant 0 : i32
    %c0_i32_1 = arith.constant 0 : i32
    return %c0_i32, %c0_i32_0 : i32, i32
  }
  func.func @transform_7(%arg0: i32) -> (i32, i32) {
    %c0_i32 = arith.constant 0 : i32
    %c0_i32_0 = arith.constant 0 : i32
    %c0_i32_1 = arith.constant 0 : i32
    return %c0_i32, %c0_i32_0 : i32, i32
  }
  func.func @transform_8(%arg0: i32) -> (i32, i32) {
    %c0_i32 = arith.constant 0 : i32
    %c0_i32_0 = arith.constant 0 : i32
    %c0_i32_1 = arith.constant 0 : i32
    return %c0_i32, %c0_i32_0 : i32, i32
  }
  func.func @transform_9(%arg0: i32) -> (i32, i32) {
    %c0_i32 = arith.constant 0 : i32
    %c0_i32_0 = arith.constant 0 : i32
    %c0_i32_1 = arith.constant 0 : i32
    return %c0_i32, %c0_i32_0 : i32, i32
  }
  func.func @transform_10(%arg0: i32) -> (i32, i32) {
    %c0_i32 = arith.constant 0 : i32
    %c0_i32_0 = arith.constant 0 : i32
    %c0_i32_1 = arith.constant 0 : i32
    return %c0_i32, %c0_i32_0 : i32, i32
  }
  func.func @transform_11(%arg0: i32) -> (i32, i32, i32) {
    %c0_i32 = arith.constant 0 : i32
    %c0_i32_0 = arith.constant 0 : i32
    %c0_i32_1 = arith.constant 0 : i32
    return %arg0, %c0_i32, %c0_i32_0 : i32, i32, i32
  }
}

</mosaic_0001>

<bundles_post_ra>
// kernel: tpu_custom_call.1
= control target key start
LH: loop header
LB: loop body
LE: loop exit
PB: predicated region body
PF: predicated region fallthrough
CT: control target
= control target key end

     0   :  { %s2279_s0 = inlined_call_operand.hbm [shape: f32[2,8,128], index: 0, kind: input, shape index: {}]   ;;  %s2280_s1 = inlined_call_operand.hbm [shape: bf16[128,384], index: 1, kind: input, shape index: {}]   ;;  %s2281_s2 = inlined_call_operand.hbm [shape: f32[1,384], index: 2, kind: input, shape index: {}]   ;;  %s2282_s3 = inlined_call_operand.vmem [shape: f32[8,128], index: 3, kind: input, shape index: {}]   ;;  %s2283_s4 = inlined_call_operand.hbm [shape: f32[8,128], index: 4, kind: input, shape index: {}]   ;;  %s2284_s5 = inlined_call_operand.hbm [shape: bf16[128,128], index: 5, kind: input, shape index: {}]   ;;  %s2285_s6 = inlined_call_operand.vmem [shape: f32[1,128], index: 6, kind: input, shape index: {}]   ;;  %s2286_s7 = inlined_call_operand.hbm [shape: bf16[128,128], index: 7, kind: input, shape index: {}]   ;;  %s2287_s8 = inlined_call_operand.vmem [shape: f32[1,128], index: 8, kind: input, shape index: {}]   ;;  %s2288_s9 = inlined_call_operand.vmem [shape: f32[8,128], index: 9, kind: input, shape index: {}]   ;;  %s2289_s10 = inlined_call_operand.vmem [shape: f32[8,128], index: 10, kind: input, shape index: {}]   ;;  %s2290_s11 = inlined_call_operand.hbm [shape: f32[2,8,128], index: 11, kind: output, shape index: {}]  }
   0x1   :  { %2295 = sst [smem:[#allocation19_spill]] %s2279_s0 }
   0x2   :  { %2296 = sst [smem:[#allocation20_spill]] %s2280_s1 }
   0x3   :  { %2297 = sst [smem:[#allocation21_spill]] %s2288_s9 }
   0x4   :  { %2298 = sst [smem:[#allocation22_spill]] %s2289_s10 }
   0x5   :  { %2299 = sst [smem:[#allocation23_spill]] %s2290_s11 }
   0x6   :  { %16 = vsyncpa [#allocation3], 0 }
   0x7   :  { %18 = vsyncpa [#allocation3 + $0x1], 0 }
   0x8   :  { %19 = vsyncpa [#allocation6], 0 }
   0x9   :  { %20 = vsyncpa [#allocation9], 0 }
   0xa   :  { %21 = vsyncpa [#allocation12], 0 }
   0xb   :  { %22 = vsyncpa [#allocation4], 0 }
   0xc   :  { %24 = vsyncpa [#allocation4 + $0x1], 0  ;;  %s1907_s17 = smov 0   ;;  %s1909_s18 = smov 0  }
   0xd   :  { %s1911_s19 = smov 0   ;;  %s1913_s20 = smov 0  }
   0xe LB: > { %s1833_s21 = smov [#allocation5]   ;;  %s1928_s23 = sadd.s32 4294967295, %s1831_s20   ;;  %s1831_s20 = sphi %s1913_s20, %s2326_s20   ;;  %s1827_s19 = sphi %s1911_s19, %s2325_s19   ;;  %s1823_s18 = sphi %s1909_s18, %s2324_s18   ;;  %s1819_s17 = sphi %s1907_s17, %s2323_s17  }
   0xf   : > { %s309_s22 = sshll.u32 %s1833_s21, 4  ;;  %p1256_p0 = scmp.ge.s32.totalorder %s1831_s20, 1  ;;  %s1933_s22 = int_to_ptr.vmem [resolvable:$true] %s309_s22 }
  0x10   : > { %p2292_p1 = scmp.eq.s32.totalorder %s1928_s23, 0  ;;  %p297_p2 = scmp.lt.s32.totalorder %s1831_s20, 3 }
  0x11   : > { %s1834_s25 = smov [#allocation8]   ;;  %s1835_s28 = smov [#allocation7]  }
  0x12   : > { %p1935_p3 = pnand %p1256_p0, %p297_p2  ;;  %s337_s26 = sshll.u32 %s1834_s25, 4  ;;  %s1948_s26 = int_to_ptr.vmem [resolvable:$true] %s337_s26 }
  0x13   : > { %s323_s29 = sshll.u32 %s1835_s28, 4  ;;  %s2302_s1 = sld [smem:[#allocation20_spill]]  ;;  %s1950_s29 = int_to_ptr.vmem [resolvable:$true] %s323_s29 }
  0x14   : > { %s2300_s24 = scalar_select %p1935_p3, 1, 0 }
  0x15   : > { %p1447_p5 = pneg %p1935_p3 }
  0x17   : > { %p1944_p6 = pnand %p1447_p5, %p2292_p1 }
  0x19   : > { %s1583_s13 = scalar_lea.hbm %s2302_s1, 3072  ;;  %p1960_p8 = pneg %p1944_p6 }
  0x1a   : > { %p1584_p7 = scmp.ne.s32.totalorder %s2302_s1, %s1583_s13  ;;  %p1590_p11 = scmp.lt.u32.totalorder %s1583_s13, %s2302_s1 }
  0x1c   : > { %p1586_p9 = pnand %p1960_p8, %p1584_p7 }
  0x1e   : > { %p1587_p10 = pneg %p1586_p9 }
  0x20   : > { %p1592_p12 = pnand %p1590_p11, %p1587_p10 }
  0x22   : > { %1595 = shalt.err (!%p1592_p12)
}
  0x23   : > { %s1596_s28 = scalar_lea.vmem %s1933_s22, 3072  ;;  %p1604_p5 = scmp.lt.s32.totalorder %s1933_s22, %s1933_s22 }
  0x24   : > { %p1597_p13 = scmp.ne.s32.totalorder %s1933_s22, %s1596_s28  ;;  %p1605_p4 = scmp.lt.s32.totalorder %s1596_s28, %s1596_s28 }
  0x26   : > { %p1599_p0 = pnand %p1597_p13, %p1960_p8  ;;  %p1606_p7 = por %p1605_p4, %p1604_p5 }
  0x28   : > { %p1600_p2 = pneg %p1599_p0 }
  0x2a   : > { %p1607_p9 = pnand %p1606_p7, %p1600_p2 }
  0x2c   : > { %1610 = shalt.err (!%p1607_p9)
}
  0x2d   : > { %s1836_s30 = smov 192   ;;  %s1837_s12 = smov 12  }
  0x2e   : > { %1450 = dma.hbm_to_vmem [thread:$0]  (!%p1944_p6), %s2302_s1, 3072, %s1933_s22, [#allocation6], %s1836_s30, %s1836_s30, %s1837_s12  }
  0x2f   : > { %s1611_s25 = scalar_lea.hbm %s2283_s4, 128 }
  0x30   : > { %p1612_p4 = scmp.ne.s32.totalorder %s2283_s4, %s1611_s25  ;;  %p1618_p12 = scmp.lt.u32.totalorder %s1611_s25, %s2283_s4 }
  0x32   : > { %p1614_p10 = pnand %p1612_p4, %p1960_p8 }
  0x34   : > { %p1615_p11 = pneg %p1614_p10 }
  0x36   : > { %p1620_p13 = pnand %p1618_p12, %p1615_p11 }
  0x38   : > { %1623 = shalt.err (!%p1620_p13)
}
  0x39   : > { %s1624_s22 = scalar_lea.vmem %s1948_s26, 128  ;;  %p1632_p7 = scmp.lt.s32.totalorder %s1948_s26, %s1948_s26 }
  0x3a   : > { %p1625_p0 = scmp.ne.s32.totalorder %s1948_s26, %s1624_s22  ;;  %p1633_p9 = scmp.lt.s32.totalorder %s1624_s22, %s1624_s22 }
  0x3c   : > { %p1627_p2 = pnand %p1625_p0, %p1960_p8  ;;  %p1634_p4 = por %p1633_p9, %p1632_p7 }
  0x3e   : > { %p1628_p5 = pneg %p1627_p2 }
  0x40   : > { %p1635_p10 = pnand %p1634_p4, %p1628_p5 }
  0x42   : > { %1638 = shalt.err (!%p1635_p10)
}
  0x43   : > { %1456 = dma.hbm_to_vmem [thread:$0]  (!%p1944_p6), %s2283_s4, 128, %s1948_s26, [#allocation9]  }
  0x44   : > { %s1639_s12 = scalar_lea.hbm %s2281_s2, 48 }
  0x45   : > { %p1640_p11 = scmp.ne.s32.totalorder %s2281_s2, %s1639_s12  ;;  %p1646_p0 = scmp.lt.u32.totalorder %s1639_s12, %s2281_s2 }
  0x47   : > { %p1642_p12 = pnand %p1640_p11, %p1960_p8 }
  0x49   : > { %p1643_p13 = pneg %p1642_p12 }
  0x4b   : > { %p1648_p2 = pnand %p1646_p0, %p1643_p13 }
  0x4d   : > { %1651 = shalt.err (!%p1648_p2)
}
  0x4e   : > { %s1652_s26 = scalar_lea.vmem %s1950_s29, 48  ;;  %s1659_s25 = scalar_lea.vmem %s1950_s29, 64 }
  0x4f   : > { %p1653_p5 = scmp.ne.s32.totalorder %s1950_s29, %s1652_s26  ;;  %p1660_p4 = scmp.lt.s32.totalorder %s1950_s29, %s1950_s29 }
  0x50   : > { %p1661_p10 = scmp.lt.s32.totalorder %s1659_s25, %s1652_s26 }
  0x51   : > { %p1655_p7 = pnand %p1653_p5, %p1960_p8 }
  0x52   : > { %p1662_p11 = por %p1661_p10, %p1660_p4 }
  0x53   : > { %p1656_p9 = pneg %p1655_p7 }
  0x55   : > { %p1663_p12 = pnand %p1662_p11, %p1656_p9 }
  0x57   : > { %1666 = shalt.err (!%p1663_p12)
}
  0x58   : > { %1453 = dma.hbm_to_vmem [thread:$0]  (!%p1944_p6), %s2281_s2, 48, %s1950_s29, [#allocation6]  }
  0x59   : > { %s1838_s9 = smov [#allocation10]   ;;  %s1667_s12 = scalar_lea.hbm %s2284_s5, 1024 }
  0x5a   : > { %s347_s10 = sshll.u32 %s1838_s9, 4  ;;  %p1668_p13 = scmp.ne.s32.totalorder %s2284_s5, %s1667_s12  ;;  %s348_s10 = int_to_ptr.vmem [resolvable:$true] %s347_s10 }
  0x5b   : > { %p1674_p5 = scmp.lt.u32.totalorder %s1667_s12, %s2284_s5 }
  0x5c   : > { %p1670_p0 = pnand %p1668_p13, %p1960_p8 }
  0x5e   : > { %p1671_p2 = pneg %p1670_p0 }
  0x60   : > { %p1676_p7 = pnand %p1674_p5, %p1671_p2 }
  0x62   : > { %1679 = shalt.err (!%p1676_p7)
}
  0x63   : > { %s1680_s29 = scalar_lea.vmem %s348_s10, 1024  ;;  %p1688_p11 = scmp.lt.s32.totalorder %s348_s10, %s348_s10 }
  0x64   : > { %p1681_p9 = scmp.ne.s32.totalorder %s348_s10, %s1680_s29  ;;  %p1689_p12 = scmp.lt.s32.totalorder %s1680_s29, %s1680_s29 }
  0x66   : > { %p1683_p4 = pnand %p1681_p9, %p1960_p8  ;;  %p1690_p1 = por %p1689_p12, %p1688_p11 }
  0x68   : > { %p1684_p10 = pneg %p1683_p4 }
  0x6a   : > { %p1691_p3 = pnand %p1690_p1, %p1684_p10 }
  0x6c   : > { %1694 = shalt.err (!%p1691_p3)
}
  0x6d   : > { %s1839_s26 = smov 64   ;;  %s1840_s25 = smov 4  }
  0x6e   : > { %1459 = dma.hbm_to_vmem [thread:$0]  (!%p1944_p6), %s2284_s5, 1024, %s348_s10, [#allocation9], %s1839_s26, %s1839_s26, %s1840_s25  }
  0x6f   : > { %s1841_s9 = smov [#allocation11]   ;;  %s1695_s13 = scalar_lea.hbm %s2286_s7, 1024 }
  0x70   : > { %s363_s11 = sshll.u32 %s1841_s9, 4  ;;  %p1696_p1 = scmp.ne.s32.totalorder %s2286_s7, %s1695_s13  ;;  %s364_s11 = int_to_ptr.vmem [resolvable:$true] %s363_s11 }
  0x71   : > { %p1702_p0 = scmp.lt.u32.totalorder %s1695_s13, %s2286_s7 }
  0x72   : > { %p1698_p3 = pnand %p1696_p1, %p1960_p8 }
  0x74   : > { %p1699_p13 = pneg %p1698_p3 }
  0x76   : > { %p1704_p2 = pnand %p1702_p0, %p1699_p13 }
  0x78   : > { %1707 = shalt.err (!%p1704_p2)
}
  0x79   : > { %s1708_s10 = scalar_lea.vmem %s364_s11, 1024  ;;  %p1716_p4 = scmp.lt.s32.totalorder %s364_s11, %s364_s11 }
  0x7a   : > { %p1709_p5 = scmp.ne.s32.totalorder %s364_s11, %s1708_s10  ;;  %p1717_p10 = scmp.lt.s32.totalorder %s1708_s10, %s1708_s10 }
  0x7c   : > { %p1711_p7 = pnand %p1709_p5, %p1960_p8  ;;  %p1718_p11 = por %p1717_p10, %p1716_p4 }
  0x7e   : > { %p1712_p9 = pneg %p1711_p7 }
  0x80   : > { %p1719_p12 = pnand %p1718_p11, %p1712_p9 }
  0x82   : > { %1722 = shalt.err (!%p1719_p12)
}
  0x83   : > { %1462 = dma.hbm_to_vmem [thread:$0]  (!%p1944_p6), %s2286_s7, 1024, %s364_s11, [#allocation12], %s1839_s26, %s1839_s26, %s1840_s25  }
  0x84   : > { %s1255_s16 = sadd.s32 4294967294, %s1831_s20   ;;  %s2066_s27 = sadd.s32 1, %s1831_s20  }
  0x85   : > { %s37_s9 = sadd.s32 1, %s1827_s19  ;;  %s34_s30 = ssub.s32 %s1831_s20, %s2066_s27 }
  0x86   : > { %p44_p8 = scmp.ne.s32.totalorder %s1827_s19, %s1823_s18  ;;  %p35_p1 = scmp.eq.s32.totalorder %s34_s30, 0 }
  0x87   : > { %p45_p3 = scmp.eq.s32.totalorder %s1831_s20, 0  ;;  %p50_p13 = scmp.ne.s32.totalorder %s1823_s18, %s1819_s17 }
  0x88   : > { %p284_p0 = scmp.eq.s32.totalorder %s1928_s23, 1  ;;  %p2304_p5 = scmp.eq.s32.totalorder %s1928_s23, 0 }
  0x89   : > { %s2078_s12 = scalar_select %p35_p1, %s1827_s19, %s37_s9  }
  0x8a   : > { %p46_p2 = por %p45_p3, %p44_p8  ;;  %p2082_p7 = por %p2304_p5, %p50_p13 }
  0x8b   : > { %p2086_p6 = por %p284_p0, %p44_p8  ;;  %p290_p9 = scmp.eq.s32.totalorder %s1255_s16, 1 }
  0x8c   : > { %p1476_p4 = scmp.lt.s32.totalorder %s1831_s20, 2  ;;  %s386_s25 = sand.u32 1, %s1827_s19  }
  0x8d   : > { %s2306_s26 = scalar_select %p2086_p6, 1, 0 }
  0x8e   : > { %p2092_p10 = por %p290_p9, %p50_p13  ;;  %s1263_s14 = sshll.u32 %s386_s25, 3 }
  0x8f   : > { %s1264_s15 = sshll.u32 %s1831_s20, 7  ;;  %s2308_s0 = sld [smem:[#allocation19_spill]] }
  0x90   : > { %s2307_s11 = scalar_select %p2092_p10, 1, 0 }
  0x91   : > { %s390_s28 = scalar_lea.vmem [#allocation2], %s1263_s14  ;;  %p2102_p11 = pnand %p1476_p4, %p46_p2 }
  0x92   : > { %s397_s22 = sshll.u32 %s390_s28, 4  ;;  %s387_s9 = scalar_lea.sflag [#allocation3], %s386_s25  ;;  %s2106_s22 = int_to_ptr.vmem [resolvable:$true] %s397_s22 }
  0x93   : > { %p1725_p8 = pneg %p2102_p11 }
  0x95   : > { %s2100_s10 = scalar_lea.hbm %s2308_s0, %s1264_s15  ;;  %s1728_s21 = scalar_lea.hbm %s2308_s0, 256 }
  0x96   : > { %s1723_s30 = scalar_lea.hbm %s2100_s10, 128  ;;  %p1729_p13 = scmp.lt.u32.totalorder %s2100_s10, %s2308_s0 }
  0x97   : > { %p1724_p12 = scmp.ne.s32.totalorder %s2100_s10, %s1723_s30  ;;  %p1730_p0 = scmp.lt.u32.totalorder %s1728_s21, %s1723_s30 }
  0x98   : > { %p1732_p5 = scmp.lt.u32.totalorder %s1723_s30, %s2100_s10 }
  0x99   : > { %p1726_p1 = pnand %p1725_p8, %p1724_p12  ;;  %p1731_p2 = por %p1730_p0, %p1729_p13 }
  0x9b   : > { %p1727_p3 = pneg %p1726_p1  ;;  %p1733_p9 = por %p1732_p5, %p1731_p2 }
  0x9d   : > { %p1734_p4 = pnand %p1733_p9, %p1727_p3 }
  0x9f   : > { %1737 = shalt.err (!%p1734_p4)
}
  0xa0   : > { %s1738_s25 = scalar_lea.vmem %s2106_s22, 128  ;;  %s1842_s15 = smov [#allocation2]  }
  0xa1   : > { %p1739_p12 = scmp.ne.s32.totalorder %s2106_s22, %s1738_s25  ;;  %s1743_s14 = sshll.u32 %s1842_s15, 4  ;;  %s1744_s14 = int_to_ptr.vmem [resolvable:$false] %s1743_s14 }
  0xa2   : > { %s1745_s29 = scalar_lea.vmem %s1744_s14, 256  ;;  %p1746_p6 = scmp.lt.s32.totalorder %s2106_s22, %s1744_s14 }
  0xa3   : > { %p1741_p1 = pnand %p1739_p12, %p1725_p8  ;;  %p1747_p13 = scmp.lt.s32.totalorder %s1745_s29, %s1738_s25 }
  0xa5   : > { %p1742_p10 = pneg %p1741_p1  ;;  %p1748_p0 = por %p1747_p13, %p1746_p6 }
  0xa7   : > { %p1749_p2 = pnand %p1748_p0, %p1742_p10 }
  0xa9   : > { %1752 = shalt.err (!%p1749_p2)
}
  0xaa   : > { %1466 = dma.hbm_to_vmem [thread:$0]  (!%p2102_p11), %s2100_s10, 128, %s2106_s22, %s387_s9  }
  0xab   : > { %p2310_p3 = scmp.ne.s32.totalorder %s2300_s24, 0 }
  0xac   : > { %s2136_s30 = sand.u32 (!%p2310_p3), 1, %s1823_s18  }
  0xad   : > { %406 = sbr.rel (%p2310_p3) target bundleno = 2311 (0x907), region = 64  ;;  %s1266_s21 = sshll.u32 (!%p2310_p3), %s2136_s30, 3 }
  0xae   : > { %s409_s28 = scalar_lea.sflag (!%p2310_p3), [#allocation3], %s2136_s30  ;;  %s2142_s25 = scalar_lea.vmem (!%p2310_p3), [#allocation2], %s1266_s21 }
  0xb4   : > { %1798 = dma.done.wait (%p2082_p7), %s409_s28, 128  }
  0xb5   : > { %1800 = vsyncadd (%p2082_p7), %s409_s28, 4294967168  ;;  %p2311_p6 = scmp.eq.s32.totalorder %s1928_s23, 0 }
  0xb7   : > { %1802 = dma.done.wait (%p2311_p6), [#allocation6], 3120   ;;  %p2312_p10 = pmov %p2311_p6 }
  0xb8   : > { %p2313_p11 = pmov %p2311_p6 }
  0xb9   : > { %1804 = vsyncadd (%p2312_p10), [#allocation6], 4294964176 }
  0xba   : > { %1806 = dma.done.wait (%p2313_p11), [#allocation9], 1152   ;;  %p2314_p8 = pmov %p2311_p6 }
  0xbb   : > { %p2315_p5 = pmov %p2311_p6 }
  0xbc   : > { %1808 = vsyncadd (%p2314_p8), [#allocation9], 4294966144 }
  0xbd   : > { %1810 = dma.done.wait (%p2315_p5), [#allocation12], 1024   ;;  %p2316_p9 = pmov %p2315_p5 }
  0xbe   : > { %v1843_v0 = vmov 0   ;;  %v1527_v1 = vld [vmem:[#allocation5 + $0x4] ss:$12 sps:$4 sm:$0xff]   ;;  %v1529_v2 = vld [vmem:[#allocation5] ss:$12 sps:$4 sm:$0xff]   ;;  %v1844_v19 = vmov 0.0   ;;  %v508_v20 = vlaneseq }
  0xbf   : > { %1812 = vsyncadd (%p2316_p9), [#allocation12], 4294966272  ;;  %683 = vmatprep.mubr.bf16.mxu0 %v1843_v0  ;;  %651 = vmatprep.subr.bf16.mxu0 %v1527_v1  ;;  %v1530_v3 = vld [vmem:[#allocation5 + $0x1c] ss:$12 sps:$4 sm:$0xff]   ;;  %v1532_v4 = vld [vmem:[#allocation5 + $0x18] ss:$12 sps:$4 sm:$0xff]  }
  0xc0   : > { %652 = vmatpush1.bf16.msra.mxu0 %v1529_v2  ;;  %v1533_v5 = vld [vmem:[#allocation5 + $0x34] ss:$12 sps:$4 sm:$0xff]   ;;  %v1535_v6 = vld [vmem:[#allocation5 + $0x30] ss:$12 sps:$4 sm:$0xff]   ;;  %v1536_v7 = vld [vmem:[#allocation5 + $0x4c] ss:$12 sps:$4 sm:$0xff]   ;;  %1351 = vmatprep.subr.bf16.mxu1 %v1844_v19 }
  0xc1   : > { %653 = vmatprep.subr.bf16.mxu0 %v1530_v3  ;;  %v1538_v8 = vld [vmem:[#allocation5 + $0x48] ss:$12 sps:$4 sm:$0xff]   ;;  %v1539_v9 = vld [vmem:[#allocation5 + $0x64] ss:$12 sps:$4 sm:$0xff]   ;;  %v1541_v10 = vld [vmem:[#allocation5 + $0x60] ss:$12 sps:$4 sm:$0xff]  }
  0xc2   : > { %v1542_v11 = vld [vmem:[#allocation5 + $0x7c] ss:$12 sps:$4 sm:$0xff]   ;;  %v1544_v12 = vld [vmem:[#allocation5 + $0x78] ss:$12 sps:$4 sm:$0xff]   ;;  %v1545_v13 = vld [vmem:[#allocation5 + $0x94] ss:$12 sps:$4 sm:$0xff]  }
  0xc3   : > { %v1547_v14 = vld [vmem:[#allocation5 + $0x90] ss:$12 sps:$4 sm:$0xff]   ;;  %v1548_v15 = vld [vmem:[#allocation5 + $0xac] ss:$12 sps:$4 sm:$0xff]   ;;  %v1550_v16 = vld [vmem:[#allocation5 + $0xa8] ss:$12 sps:$4 sm:$0xff]  }
  0xc4   : > { %654 = vmatpush1.bf16.msra.mxu0 %v1532_v4  ;;  %v2161_v17 = vld [vmem:[%s2142_s25] sm:$0xff]  ;;  %vm1845_vm0 = vmmov 0   ;;  %v509_v21 = vshrl.u32 %v508_v20, 7  ;;  %v506_v23 = vld [vmem:[#allocation7] sm:$0x7]  ;;  %vm775_vm1 = vcmask 64512  }
  0xc5   : > { %655 = vmatprep.subr.bf16.mxu0 %v1533_v5  ;;  %v473_v18 = vpack.c.bf16 %v2161_v17, %v2161_v17  ;;  %1367 = vmatprep.mubr.msk.bf16.mxu1 %vm1845_vm0, %v1844_v19  ;;  %v1551_v35 = vld [vmem:[#allocation5 + $0x8] ss:$12 sps:$4 sm:$0xff]   ;;  %v1552_v36 = vld [vmem:[#allocation5 + $0x20] ss:$12 sps:$4 sm:$0xff]   ;;  %v1553_v37 = vld [vmem:[#allocation5 + $0x38] ss:$12 sps:$4 sm:$0xff]  }
  0xc6   : > { %v514_v22 = vsub.s32 1, %v509_v21  ;;  %v510_v25 = vsub.s32 0, %v509_v21  ;;  %1352 = vmatpush3.bf16.msra.mxu1 %v1551_v35  ;;  %v1554_v38 = vld [vmem:[#allocation5 + $0x50] ss:$12 sps:$4 sm:$0xff]   ;;  %v1555_v39 = vld [vmem:[#allocation5 + $0x68] ss:$12 sps:$4 sm:$0xff]  }
  0xc7   : > { %1353 = vmatprep.subr.bf16.mxu1 %v1844_v19  ;;  %v1556_v40 = vld [vmem:[#allocation5 + $0x80] ss:$12 sps:$4 sm:$0xff]   ;;  %v1557_v41 = vld [vmem:[#allocation5 + $0x98] ss:$12 sps:$4 sm:$0xff]   ;;  %v1558_v42 = vld [vmem:[#allocation5 + $0xb0] ss:$12 sps:$4 sm:$0xff]  }
  0xc8   : > { %656 = vmatpush1.bf16.msra.mxu0 %v1535_v6  ;;  %v515_v24 = vrot.slane %v506_v23, %v514_v22  ;;  %v511_v30 = vrot.slane %v506_v23, %v510_v25  ;;  %v518_v48 = vsub.s32 2, %v509_v21  ;;  %vm791_vm2 = vcmask 1043456   ;;  %v1559_v21 = vld [vmem:[#allocation10] sm:$0xff]   ;;  %v1560_v22 = vld [vmem:[#allocation10 + $0x8] sm:$0xff]   ;;  %s2317_s29 = sld [smem:[#allocation21_spill]]  ;;  %s2318_s24 = sld [smem:[#allocation22_spill]] }
  0xc9   : > { %657 = vmatprep.subr.bf16.mxu0 %v1536_v7  ;;  %v1564_v25 = vld [vmem:[#allocation10 + $0x28] sm:$0xff]   ;;  %s1317_s13 = sshll.u32 %s1928_s23, 7  ;;  %s470_s10 = scalar_lea.vmem [#allocation13], %s1266_s21 }
  0xca   : > { %1354 = vmatpush3.bf16.msra.mxu1 %v1552_v36  ;;  %v519_v49 = vrot.slane %v506_v23, %v518_v48  ;;  %v1562_v23 = vld [vmem:[#allocation10 + $0x18] sm:$0xff]   ;;  %s1137_s22 = sshll.u32 %s470_s10, 4  ;;  %s2319_s0 = sld [smem:[#allocation23_spill]]  ;;  %s2237_s22 = int_to_ptr.vmem [resolvable:$true] %s1137_s22 }
  0xcb   : > { %1355 = vmatprep.subr.bf16.mxu1 %v1844_v19  ;;  %s1124_s15 = scalar_lea.sflag [#allocation4], %s2136_s30  ;;  %s1753_s14 = scalar_lea.vmem %s2237_s22, 128 }
  0xcc   : > { %658 = vmatpush1.bf16.msra.mxu0 %v1538_v8  ;;  %p1754_p7 = scmp.ne.s32.totalorder %s2237_s22, %s1753_s14  ;;  %p2320_p4 = scmp.ne.s32.totalorder %s2306_s26, 0 }
  0xcd   : > { %659 = vmatprep.subr.bf16.mxu0 %v1539_v9  ;;  %s1846_s23 = smov [#allocation13]  }
  0xce   : > { %1356 = vmatpush3.bf16.msra.mxu1 %v1553_v37  ;;  %p1755_p12 = pnand %p1754_p7, %p2320_p4  ;;  %s1757_s21 = sshll.u32 %s1846_s23, 4  ;;  %s1758_s21 = int_to_ptr.vmem [resolvable:$false] %s1757_s21 }
  0xcf   : > { %1357 = vmatprep.subr.bf16.mxu1 %v1844_v19  ;;  %p1760_p13 = scmp.lt.s32.totalorder %s2237_s22, %s1758_s21 }
  0xd0   : > { %660 = vmatpush1.bf16.msra.mxu0 %v1541_v10  ;;  %s2235_s1 = scalar_lea.hbm %s2319_s0, %s1317_s13  ;;  %p1756_p1 = pneg %p1755_p12 }
  0xd1   : > { %661 = vmatprep.subr.bf16.mxu0 %v1542_v11 }
  0xd2   : > { %1358 = vmatpush3.bf16.msra.mxu1 %v1554_v38 }
  0xd3   : > { %1359 = vmatprep.subr.bf16.mxu1 %v1844_v19 }
  0xd4   : > { %662 = vmatpush1.bf16.msra.mxu0 %v1544_v12 }
  0xd5   : > { %663 = vmatprep.subr.bf16.mxu0 %v1545_v13  ;;  %v2193_v13 = vand.u32 127, %v508_v20  ;;  %v1561_v20 = vld [vmem:[#allocation10 + $0x10] sm:$0xff]  }
  0xd6   : > { %1360 = vmatpush3.bf16.msra.mxu1 %v1555_v39 }
  0xd7   : > { %1361 = vmatprep.subr.bf16.mxu1 %v1844_v19  ;;  %vm849_vm3 = vcmp.lt.s32.totalorder %v2193_v13, 32  ;;  %v1094_v13 = vld [vmem:[%s2317_s29] sm:$0xff]  ;;  %s1759_s29 = scalar_lea.vmem %s1758_s21, 256 }
  0xd8   : > { %664 = vmatpush1.bf16.msra.mxu0 %v1547_v14  ;;  %p1761_p0 = scmp.lt.s32.totalorder %s1759_s29, %s1753_s14 }
  0xd9   : > { %665 = vmatprep.subr.bf16.mxu0 %v1548_v15 }
  0xda   : > { %1362 = vmatpush3.bf16.msra.mxu1 %v1556_v40  ;;  %p1762_p2 = por %p1761_p0, %p1760_p13 }
  0xdb   : > { %1363 = vmatprep.subr.bf16.mxu1 %v1844_v19 }
  0xdc   : > { %666 = vmatpush1.bf16.msra.mxu0 %v1550_v16  ;;  %p1763_p3 = pnand %p1762_p2, %p1756_p1 }
  0xdd   : > { %1371 = vmatprep.subr.bf16.mxu0 %v1844_v19 }
  0xde   : > { %1364 = vmatpush3.bf16.msra.mxu1 %v1557_v41 }
  0xdf   : > { %684 = vmatmul.mubr.bf16.vlgmr.msra.gmra.mrb[0].mxu0 %v473_v18  ;;  %1365 = vmatprep.subr.bf16.mxu1 %v1844_v19 }
  0xe0   : > { %1373 = vmatprep.mubr.msk.bf16.mxu0 %vm1845_vm0, %v1844_v19 }
  0xe2   : > { %1366 = vmatpush3.bf16.msra.mxu1 %v1558_v42 }
  0xe3   : > { %1377 = vmatprep.subr.bf16.mxu1 %v1844_v19 }
  0xe5   : > { %1368 = vmatmul.mubr.bf16.vlgmr.msra.gmra.mrb[0].mxu1 %v473_v18 }
  0xe6   : > { %1379 = vmatprep.mubr.msk.bf16.mxu1 %vm1845_vm0, %v1844_v19 }
 0x1b2   : > { %v685_v26 = vpop.f32.mrb[0].mxu0 }
 0x1b3   : > { %v687_v27 = vpop.f32.mrb[1].mxu0  ;;  %v686_v33 = vadd.f32 %v685_v26, %v511_v30  ;;  %v1565_v26 = vld [vmem:[#allocation10 + $0x30] sm:$0xff]  }
 0x1b4   : > { %v688_v28 = vadd.f32 %v687_v27, %v515_v24  ;;  %v689_v29 = vpop.f32.mrb[2].mxu0  ;;  %v1563_v24 = vld [vmem:[#allocation10 + $0x20] sm:$0xff]   ;;  %v1566_v27 = vld [vmem:[#allocation10 + $0x38] sm:$0xff]   ;;  %v1569_v30 = vld [vmem:[#allocation11 + $0x10] sm:$0xff]  }
 0x1b5   : > { %v690_v31 = vpop.f32.mrb[3].mxu0  ;;  %v732_v34 = vpack.c.bf16 %v686_v33, %v686_v33  ;;  %v1568_v29 = vld [vmem:[#allocation11 + $0x8] sm:$0xff]  }
 0x1b6   : > { %v733_v32 = vpack.c.bf16 %v688_v28, %v688_v28  ;;  %v1567_v28 = vld [vmem:[#allocation11] sm:$0xff]   ;;  %v1570_v31 = vld [vmem:[#allocation11 + $0x18] sm:$0xff]   ;;  %v1572_v33 = vld [vmem:[#allocation11 + $0x28] sm:$0xff]  }
 0x1b8   : > { %1372 = vmatpush3.bf16.xpose.msra.mxu0 %v733_v32  ;;  %v726_v50 = vpop.f32.mrb[0].mxu1  ;;  %v1571_v32 = vld [vmem:[#allocation11 + $0x20] sm:$0xff]  }
 0x1b9   : > { %1383 = vmatprep.subr.bf16.mxu0 %v1844_v19  ;;  %v727_v51 = vadd.f32 %v726_v50, %v519_v49  ;;  %v1369_v52 = vpop.f32.mrb[1].mxu1  ;;  %v1573_v50 = vld [vmem:[#allocation11 + $0x30] sm:$0xff]  }
 0x1ba   : > { %v729_v53 = vpop.f32.mrb[2].mxu1  ;;  %v1298_v52 = vld [vmem:[%s2285_s6] ss:$0 sm:$0xff] }
 0x1bb   : > { %v734_v54 = vpack.c.bf16 %v727_v51, %v727_v51  ;;  %v1370_v55 = vpop.f32.mrb[3].mxu1  ;;  %v1574_v51 = vld [vmem:[#allocation11 + $0x38] sm:$0xff]  }
 0x1bd   : > { %v793_v56 = vsel %vm791_vm2, %v734_v54, 0 }
 0x1be   : > { %1378 = vmatpush3.bf16.msra.mxu1 %v793_v56 }
 0x1bf   : > { %1374 = vmatmul.mubr.bf16.vlgmr.msra.gmra.mrb[4].mxu0 %v732_v34  ;;  %1403 = vmatprep.subr.bf16.mxu1 %v1844_v19 }
 0x1c0   : > { %1399 = vmatprep.mubr.msk.bf16.mxu0 %vm1845_vm0, %v1844_v19  ;;  %1384 = vmatpush3.bf16.msra.mxu0 %v1559_v21 }
 0x1c1   : > { %1385 = vmatprep.subr.bf16.mxu0 %v1844_v19 }
 0x1c4   : > { %1386 = vmatpush3.bf16.msra.mxu0 %v1560_v22 }
 0x1c5   : > { %1387 = vmatprep.subr.bf16.mxu0 %v1844_v19 }
 0x1c8   : > { %1388 = vmatpush3.bf16.msra.mxu0 %v1561_v20 }
 0x1c9   : > { %1389 = vmatprep.subr.bf16.mxu0 %v1844_v19 }
 0x1cc   : > { %1390 = vmatpush3.bf16.msra.mxu0 %v1562_v23 }
 0x1cd   : > { %1391 = vmatprep.subr.bf16.mxu0 %v1844_v19 }
 0x1d0   : > { %1392 = vmatpush3.bf16.msra.mxu0 %v1563_v24 }
 0x1d1   : > { %1393 = vmatprep.subr.bf16.mxu0 %v1844_v19 }
 0x1d4   : > { %1394 = vmatpush3.bf16.msra.mxu0 %v1564_v25 }
 0x1d5   : > { %1395 = vmatprep.subr.bf16.mxu0 %v1844_v19 }
 0x1d8   : > { %1396 = vmatpush3.bf16.msra.mxu0 %v1565_v26  ;;  %v1095_v26 = vld [vmem:[%s2318_s24] sm:$0xff] }
 0x1d9   : > { %1397 = vmatprep.subr.bf16.mxu0 %v1844_v19 }
 0x1dc   : > { %1398 = vmatpush3.bf16.msra.mxu0 %v1566_v27 }
 0x292   : > { %v769_v43 = vpop.f32.mrb[4].mxu0 }
 0x293   : > { %v1375_v44 = vpop.f32.mrb[5].mxu0  ;;  %v776_v45 = vsel %vm775_vm1, %v769_v43, -inf }
 0x294   : > { %777 = vmax.xlane.f32.xlu0 %v776_v45  ;;  %v772_v46 = vpop.f32.mrb[6].mxu0  ;;  %v835_v44 = vld [vmem:[%s2282_s3] sm:$0xff] }
 0x295   : > { %v1376_v47 = vpop.f32.mrb[7].mxu0  ;;  %v836_v46 = vld [vmem:[#allocation8] sm:$0xff] }
 0x321   : > { %v778_v57 = vpop.xlane.xlu0 %777 }
 0x322   : > { %v779_v58 = vsub.f32 %v769_v43, %v778_v57 }
 0x324   : > { %v780_v59 = vmul.f32 1.442695, %v779_v58 }
 0x326   : > { %1575 = vpow2.f32 %v780_v59 }
 0x330   : > { %v1576_v60 = vpop.eup %1575 }
 0x331   : > { %v782_v61 = vsel %vm775_vm1, %v1576_v60, 0.0 }
 0x332   : > { %783 = vadd.xlane.f32.xlu0 %v782_v61 }
 0x3bf   : > { %v784_v62 = vpop.xlane.xlu0 %783 }
 0x3c0   : > { %1577 = vrcp.f32 %v784_v62 }
 0x3ca   : > { %v1578_v63 = vpop.eup %1577 }
 0x3cb   : > { %v786_v0 = vmul.f32 %v1578_v63, %v1576_v60  ;;  %v1307_v60 = vld [vmem:[%s2287_s8] ss:$0 sm:$0xff] }
 0x3cd   : > { %v787_v1 = vpack.c.bf16 %v786_v0, %v786_v0 }
 0x3cf   : > { %1380 = vmatmul.mubr.msk.bf16.vlgmr.msra.gmra.mrb[4].mxu1 %vm775_vm1, %v787_v1 }
 0x3d0   : > { %1419 = vmatprep.mubr.msk.bf16.mxu1 %vm1845_vm0, %v1844_v19  ;;  %1404 = vmatpush3.bf16.msra.mxu1 %v1567_v28 }
 0x3d1   : > { %1405 = vmatprep.subr.bf16.mxu1 %v1844_v19 }
 0x3d4   : > { %1406 = vmatpush3.bf16.msra.mxu1 %v1568_v29 }
 0x3d5   : > { %1407 = vmatprep.subr.bf16.mxu1 %v1844_v19 }
 0x3d8   : > { %1408 = vmatpush3.bf16.msra.mxu1 %v1569_v30 }
 0x3d9   : > { %1409 = vmatprep.subr.bf16.mxu1 %v1844_v19 }
 0x3dc   : > { %1410 = vmatpush3.bf16.msra.mxu1 %v1570_v31 }
 0x3dd   : > { %1411 = vmatprep.subr.bf16.mxu1 %v1844_v19 }
 0x3e0   : > { %1412 = vmatpush3.bf16.msra.mxu1 %v1571_v32 }
 0x3e1   : > { %1413 = vmatprep.subr.bf16.mxu1 %v1844_v19 }
 0x3e4   : > { %1414 = vmatpush3.bf16.msra.mxu1 %v1572_v33 }
 0x3e5   : > { %1415 = vmatprep.subr.bf16.mxu1 %v1844_v19 }
 0x3e8   : > { %1416 = vmatpush3.bf16.msra.mxu1 %v1573_v50 }
 0x3e9   : > { %1417 = vmatprep.subr.bf16.mxu1 %v1844_v19 }
 0x3ec   : > { %1418 = vmatpush3.bf16.msra.mxu1 %v1574_v51 }
 0x4a2   : > { %v829_v2 = vpop.f32.mrb[4].mxu1 }
 0x4a3   : > { %v830_v3 = vadd.f32 %v829_v2, %v2161_v17  ;;  %v1381_v4 = vpop.f32.mrb[5].mxu1 }
 0x4a4   : > { %v832_v5 = vpop.f32.mrb[6].mxu1 }
 0x4a5   : > { %837 = vadd.xlane.f32.xlu1 %v830_v3  ;;  %v1382_v6 = vpop.f32.mrb[7].mxu1 }
 0x532   : > { %v838_v7 = vpop.xlane.xlu1 %837 }
 0x533   : > { %v839_v8 = vrot.slane %v838_v7, 4 }
 0x535   : > { %v840_v9 = vadd.f32 %v839_v8, %v838_v7 }
 0x537   : > { %v841_v10 = vrot.slane %v840_v9, 2 }
 0x539   : > { %v842_v11 = vadd.f32 %v841_v10, %v840_v9 }
 0x53b   : > { %v843_v12 = vrot.slane %v842_v11, 1 }
 0x53d   : > { %v844_v14 = vadd.f32 %v843_v12, %v842_v11 }
 0x53f   : > { %v845_v15 = vmul.f32 0.00390625, %v844_v14 }
 0x541   : > { %v846_v16 = vsub.f32 %v830_v3, %v845_v15 }
 0x543   : > { %v852_v17 = vsel %vm849_vm3, %v846_v16, 0.0 }
 0x544   : > { %v853_v18 = vmul.f32 %v852_v17, %v852_v17 }
 0x546   : > { %854 = vadd.xlane.f32.xlu1 %v853_v18 }
 0x5d3   : > { %v855_v34 = vpop.xlane.xlu1 %854 }
 0x5d4   : > { %v856_v35 = vrot.slane %v855_v34, 4 }
 0x5d6   : > { %v857_v36 = vadd.f32 %v856_v35, %v855_v34 }
 0x5d8   : > { %v858_v37 = vrot.slane %v857_v36, 2 }
 0x5da   : > { %v859_v38 = vadd.f32 %v858_v37, %v857_v36 }
 0x5dc   : > { %v860_v39 = vrot.slane %v859_v38, 1 }
 0x5de   : > { %v861_v40 = vadd.f32 %v860_v39, %v859_v38 }
 0x5e0   : > { %v862_v41 = vmul.f32 0.00390625, %v861_v40 }
 0x5e2   : > { %v863_v42 = vadd.f32 1e-08, %v862_v41 }
 0x5e4   : > { %1579 = vrsqrt.f32 %v863_v42 }
 0x5ee   : > { %v1580_v43 = vpop.eup %1579 }
 0x5ef   : > { %v865_v45 = vmul.f32 %v1580_v43, %v852_v17 }
 0x5f1   : > { %v866_v47 = vmul.f32 %v865_v45, %v835_v44 }
 0x5f3   : > { %v867_v48 = vadd.f32 %v866_v47, %v836_v46 }
 0x5f5   : > { %v868_v49 = vpack.c.bf16 %v867_v48, %v867_v48 }
 0x5f7   : > { %1400 = vmatmul.mubr.bf16.vlgmr.msra.gmra.mrb[8].mxu0 %v868_v49 }
 0x6ca   : > { %v974_v53 = vpop.f32.mrb[8].mxu0 }
 0x6cb   : > { %v975_v54 = vadd.f32 %v1298_v52, %v974_v53  ;;  %v1401_v55 = vpop.f32.mrb[9].mxu0 }
 0x6cc   : > { %v977_v56 = vpop.f32.mrb[10].mxu0 }
 0x6cd   : > { %v980_v57 = vmax.f32 %v975_v54, 0.0  ;;  %v1402_v58 = vpop.f32.mrb[11].mxu0 }
 0x6cf   : > { %v981_v59 = vpack.c.bf16 %v980_v57, %v980_v57 }
 0x6d1   : > { %1420 = vmatmul.mubr.bf16.vlgmr.msra.gmra.mrb[8].mxu1 %v981_v59 }
 0x7a4   : > { %v1087_v61 = vpop.f32.mrb[8].mxu1 }
 0x7a5   : > { %v1088_v19 = vadd.f32 %v1307_v60, %v1087_v61  ;;  %v1421_v62 = vpop.f32.mrb[9].mxu1 }
 0x7a6   : > { %v1090_v63 = vpop.f32.mrb[10].mxu1 }
 0x7a7   : > { %v1422_v0 = vpop.f32.mrb[11].mxu1  ;;  %v1093_v1 = vadd.f32 %v1088_v19, %v867_v48 }
 0x7a9   : > { %1096 = vadd.xlane.f32.xlu0 %v1093_v1 }
 0x836   : > { %v1097_v2 = vpop.xlane.xlu0 %1096 }
 0x837   : > { %v1098_v3 = vrot.slane %v1097_v2, 4 }
 0x839   : > { %v1099_v4 = vadd.f32 %v1098_v3, %v1097_v2 }
 0x83b   : > { %v1100_v5 = vrot.slane %v1099_v4, 2 }
 0x83d   : > { %v1101_v6 = vadd.f32 %v1100_v5, %v1099_v4 }
 0x83f   : > { %v1102_v7 = vrot.slane %v1101_v6, 1 }
 0x841   : > { %v1103_v8 = vadd.f32 %v1102_v7, %v1101_v6 }
 0x843   : > { %v1104_v9 = vmul.f32 0.00390625, %v1103_v8 }
 0x845   : > { %v1105_v10 = vsub.f32 %v1093_v1, %v1104_v9 }
 0x847   : > { %v1106_v11 = vsel %vm849_vm3, %v1105_v10, 0.0 }
 0x848   : > { %v1107_v12 = vmul.f32 %v1106_v11, %v1106_v11 }
 0x84a   : > { %1108 = vadd.xlane.f32.xlu1 %v1107_v12 }
 0x8d7   : > { %v1109_v14 = vpop.xlane.xlu1 %1108 }
 0x8d8   : > { %v1110_v15 = vrot.slane %v1109_v14, 4 }
 0x8da   : > { %v1111_v16 = vadd.f32 %v1110_v15, %v1109_v14 }
 0x8dc   : > { %v1112_v17 = vrot.slane %v1111_v16, 2 }
 0x8de   : > { %v1113_v18 = vadd.f32 %v1112_v17, %v1111_v16 }
 0x8e0   : > { %v1114_v21 = vrot.slane %v1113_v18, 1 }
 0x8e2   : > { %v1115_v22 = vadd.f32 %v1114_v21, %v1113_v18 }
 0x8e4   : > { %v1116_v20 = vmul.f32 0.00390625, %v1115_v22 }
 0x8e6   : > { %v1117_v23 = vadd.f32 1e-08, %v1116_v20 }
 0x8e8   : > { %1581 = vrsqrt.f32 %v1117_v23 }
 0x8f2   : > { %v1582_v24 = vpop.eup %1581 }
 0x8f3   : > { %v1119_v25 = vmul.f32 %v1582_v24, %v1106_v11 }
 0x8f5   : > { %v1120_v27 = vmul.f32 %v1119_v25, %v1094_v13 }
 0x8f7   : > { %v1121_v28 = vadd.f32 %v1120_v27, %v1095_v26 }
 0x8f9   : > { %1122 = vst [vmem:[%s470_s10] sm:$0xff] %v1121_v28 }
 0x8fa   : > { %1766 = shalt.err (!%p1763_p3)
}
 0x8fb   : > { %s1767_s30 = scalar_lea.hbm %s2235_s1, 128  ;;  %s1771_s24 = scalar_lea.hbm %s2319_s0, 256 }
 0x8fc   : > { %p1768_p6 = scmp.ne.s32.totalorder %s2235_s1, %s1767_s30  ;;  %p1772_p8 = scmp.lt.u32.totalorder %s2235_s1, %s2319_s0 }
 0x8fd   : > { %p1773_p5 = scmp.lt.u32.totalorder %s1771_s24, %s1767_s30  ;;  %p1775_p7 = scmp.lt.u32.totalorder %s1767_s30, %s2235_s1 }
 0x8fe   : > { %p1769_p10 = pnand %p1768_p6, %p2320_p4 }
 0x8ff   : > { %p1774_p9 = por %p1773_p5, %p1772_p8 }
 0x900   : > { %p1770_p11 = pneg %p1769_p10 }
 0x901   : > { %p1776_p12 = por %p1775_p7, %p1774_p9 }
 0x903   : > { %p1777_p1 = pnand %p1776_p12, %p1770_p11 }
 0x905   : > { %1780 = shalt.err (!%p1777_p1)
}
 0x906   : > { %1445 = dma.vmem_to_hbm [thread:$0]  (%p2320_p4), %s2237_s22, 128, %s2235_s1, %s1124_s15  }
 0x907 PF: > { %s1149_s16 = sand.u32 1, %s1819_s17   ;;  %p2321_p13 = scmp.ne.s32.totalorder %s2307_s11, 0 }
 0x908   : > { %p2322_p0 = scmp.ge.s32.totalorder %s1831_s20, 2  ;;  %s1150_s9 = scalar_lea.sflag [#allocation4], %s1149_s16 }
 0x90a   : > { %p1468_p2 = pnand %p2322_p0, %p2321_p13 }
 0x90c   : > { %1814 = dma.done.wait (!%p1468_p2), %s1150_s9, 128  }
 0x90d   : > { %1816 = vsyncadd (!%p1468_p2), %s1150_s9, 4294967168  ;;  %p27_p3 = scmp.ge.s32.totalorder %s2066_s27, 4   ;;  %s2323_s17 = smov %s1823_s18 }
 0x90e   : > { %s2324_s18 = smov %s1827_s19  ;;  %s2325_s19 = smov %s2078_s12 }
 0x90f   : > { %s2326_s20 = smov %s2066_s27  ;;  %29 = sbr.rel (!%p27_p3) target bundleno = 14 (0xe), region = 129 }
 0x916   :  { %1155 = vsyncpa [#allocation3], 1 }
 0x917   :  { %1157 = vsyncpa [#allocation3 + $0x1], 1 }
 0x918   :  { %1158 = vsyncpa [#allocation6], 1 }
 0x919   :  { %1159 = vsyncpa [#allocation9], 1 }
 0x91a   :  { %1160 = vsyncpa [#allocation12], 1 }
 0x91b   :  { %1161 = vsyncpa [#allocation4], 1 }
 0x91c   :  { %1163 = vsyncpa [#allocation4 + $0x1], 1 }

// kernel: tpu_custom_call.1
= control target key start
LH: loop header
LB: loop body
LE: loop exit
PB: predicated region body
PF: predicated region fallthrough
CT: control target
= control target key end

     0   :  { %s2279_s0 = inlined_call_operand.hbm [shape: f32[2,8,128], index: 0, kind: input, shape index: {}]   ;;  %s2280_s1 = inlined_call_operand.hbm [shape: bf16[128,384], index: 1, kind: input, shape index: {}]   ;;  %s2281_s2 = inlined_call_operand.hbm [shape: f32[1,384], index: 2, kind: input, shape index: {}]   ;;  %s2282_s3 = inlined_call_operand.vmem [shape: f32[8,128], index: 3, kind: input, shape index: {}]   ;;  %s2283_s4 = inlined_call_operand.hbm [shape: f32[8,128], index: 4, kind: input, shape index: {}]   ;;  %s2284_s5 = inlined_call_operand.hbm [shape: bf16[128,128], index: 5, kind: input, shape index: {}]   ;;  %s2285_s6 = inlined_call_operand.vmem [shape: f32[1,128], index: 6, kind: input, shape index: {}]   ;;  %s2286_s7 = inlined_call_operand.hbm [shape: bf16[128,128], index: 7, kind: input, shape index: {}]   ;;  %s2287_s8 = inlined_call_operand.vmem [shape: f32[1,128], index: 8, kind: input, shape index: {}]   ;;  %s2288_s9 = inlined_call_operand.vmem [shape: f32[8,128], index: 9, kind: input, shape index: {}]   ;;  %s2289_s10 = inlined_call_operand.vmem [shape: f32[8,128], index: 10, kind: input, shape index: {}]   ;;  %s2290_s11 = inlined_call_operand.hbm [shape: f32[2,8,128], index: 11, kind: output, shape index: {}]  }
   0x1   :  { %2295 = sst [smem:[#allocation19_spill]] %s2279_s0 }
   0x2   :  { %2296 = sst [smem:[#allocation20_spill]] %s2280_s1 }
   0x3   :  { %2297 = sst [smem:[#allocation21_spill]] %s2288_s9 }
   0x4   :  { %2298 = sst [smem:[#allocation22_spill]] %s2289_s10 }
   0x5   :  { %2299 = sst [smem:[#allocation23_spill]] %s2290_s11 }
   0x6   :  { %16 = vsyncpa [#allocation3], 0 }
   0x7   :  { %18 = vsyncpa [#allocation3 + $0x1], 0 }
   0x8   :  { %19 = vsyncpa [#allocation6], 0 }
   0x9   :  { %20 = vsyncpa [#allocation9], 0 }
   0xa   :  { %21 = vsyncpa [#allocation12], 0 }
   0xb   :  { %22 = vsyncpa [#allocation4], 0 }
   0xc   :  { %24 = vsyncpa [#allocation4 + $0x1], 0  ;;  %s1907_s17 = smov 0   ;;  %s1909_s18 = smov 0  }
   0xd   :  { %s1911_s19 = smov 0   ;;  %s1913_s20 = smov 0  }
   0xe LB: > { %s1833_s21 = smov [#allocation5]   ;;  %s1928_s23 = sadd.s32 4294967295, %s1831_s20   ;;  %s1831_s20 = sphi %s1913_s20, %s2326_s20   ;;  %s1827_s19 = sphi %s1911_s19, %s2325_s19   ;;  %s1823_s18 = sphi %s1909_s18, %s2324_s18   ;;  %s1819_s17 = sphi %s1907_s17, %s2323_s17  }
   0xf   : > { %s309_s22 = sshll.u32 %s1833_s21, 4  ;;  %p1256_p0 = scmp.ge.s32.totalorder %s1831_s20, 1  ;;  %s1933_s22 = int_to_ptr.vmem [resolvable:$true] %s309_s22 }
  0x10   : > { %p2292_p1 = scmp.eq.s32.totalorder %s1928_s23, 0  ;;  %p297_p2 = scmp.lt.s32.totalorder %s1831_s20, 3 }
  0x11   : > { %s1834_s25 = smov [#allocation8]   ;;  %s1835_s28 = smov [#allocation7]  }
  0x12   : > { %p1935_p3 = pnand %p1256_p0, %p297_p2  ;;  %s337_s26 = sshll.u32 %s1834_s25, 4  ;;  %s1948_s26 = int_to_ptr.vmem [resolvable:$true] %s337_s26 }
  0x13   : > { %s323_s29 = sshll.u32 %s1835_s28, 4  ;;  %s2302_s1 = sld [smem:[#allocation20_spill]]  ;;  %s1950_s29 = int_to_ptr.vmem [resolvable:$true] %s323_s29 }
  0x14   : > { %s2300_s24 = scalar_select %p1935_p3, 1, 0 }
  0x15   : > { %p1447_p5 = pneg %p1935_p3 }
  0x17   : > { %p1944_p6 = pnand %p1447_p5, %p2292_p1 }
  0x19   : > { %s1583_s13 = scalar_lea.hbm %s2302_s1, 3072  ;;  %p1960_p8 = pneg %p1944_p6 }
  0x1a   : > { %p1584_p7 = scmp.ne.s32.totalorder %s2302_s1, %s1583_s13  ;;  %p1590_p11 = scmp.lt.u32.totalorder %s1583_s13, %s2302_s1 }
  0x1c   : > { %p1586_p9 = pnand %p1960_p8, %p1584_p7 }
  0x1e   : > { %p1587_p10 = pneg %p1586_p9 }
  0x20   : > { %p1592_p12 = pnand %p1590_p11, %p1587_p10 }
  0x22   : > { %1595 = shalt.err (!%p1592_p12)
}
  0x23   : > { %s1596_s28 = scalar_lea.vmem %s1933_s22, 3072  ;;  %p1604_p5 = scmp.lt.s32.totalorder %s1933_s22, %s1933_s22 }
  0x24   : > { %p1597_p13 = scmp.ne.s32.totalorder %s1933_s22, %s1596_s28  ;;  %p1605_p4 = scmp.lt.s32.totalorder %s1596_s28, %s1596_s28 }
  0x26   : > { %p1599_p0 = pnand %p1597_p13, %p1960_p8  ;;  %p1606_p7 = por %p1605_p4, %p1604_p5 }
  0x28   : > { %p1600_p2 = pneg %p1599_p0 }
  0x2a   : > { %p1607_p9 = pnand %p1606_p7, %p1600_p2 }
  0x2c   : > { %1610 = shalt.err (!%p1607_p9)
}
  0x2d   : > { %s1836_s30 = smov 192   ;;  %s1837_s12 = smov 12  }
  0x2e   : > { %1450 = dma.hbm_to_vmem [thread:$0]  (!%p1944_p6), %s2302_s1, 3072, %s1933_s22, [#allocation6], %s1836_s30, %s1836_s30, %s1837_s12  }
  0x2f   : > { %s1611_s25 = scalar_lea.hbm %s2283_s4, 128 }
  0x30   : > { %p1612_p4 = scmp.ne.s32.totalorder %s2283_s4, %s1611_s25  ;;  %p1618_p12 = scmp.lt.u32.totalorder %s1611_s25, %s2283_s4 }
  0x32   : > { %p1614_p10 = pnand %p1612_p4, %p1960_p8 }
  0x34   : > { %p1615_p11 = pneg %p1614_p10 }
  0x36   : > { %p1620_p13 = pnand %p1618_p12, %p1615_p11 }
  0x38   : > { %1623 = shalt.err (!%p1620_p13)
}
  0x39   : > { %s1624_s22 = scalar_lea.vmem %s1948_s26, 128  ;;  %p1632_p7 = scmp.lt.s32.totalorder %s1948_s26, %s1948_s26 }
  0x3a   : > { %p1625_p0 = scmp.ne.s32.totalorder %s1948_s26, %s1624_s22  ;;  %p1633_p9 = scmp.lt.s32.totalorder %s1624_s22, %s1624_s22 }
  0x3c   : > { %p1627_p2 = pnand %p1625_p0, %p1960_p8  ;;  %p1634_p4 = por %p1633_p9, %p1632_p7 }
  0x3e   : > { %p1628_p5 = pneg %p1627_p2 }
  0x40   : > { %p1635_p10 = pnand %p1634_p4, %p1628_p5 }
  0x42   : > { %1638 = shalt.err (!%p1635_p10)
}
  0x43   : > { %1456 = dma.hbm_to_vmem [thread:$0]  (!%p1944_p6), %s2283_s4, 128, %s1948_s26, [#allocation9]  }
  0x44   : > { %s1639_s12 = scalar_lea.hbm %s2281_s2, 48 }
  0x45   : > { %p1640_p11 = scmp.ne.s32.totalorder %s2281_s2, %s1639_s12  ;;  %p1646_p0 = scmp.lt.u32.totalorder %s1639_s12, %s2281_s2 }
  0x47   : > { %p1642_p12 = pnand %p1640_p11, %p1960_p8 }
  0x49   : > { %p1643_p13 = pneg %p1642_p12 }
  0x4b   : > { %p1648_p2 = pnand %p1646_p0, %p1643_p13 }
  0x4d   : > { %1651 = shalt.err (!%p1648_p2)
}
  0x4e   : > { %s1652_s26 = scalar_lea.vmem %s1950_s29, 48  ;;  %s1659_s25 = scalar_lea.vmem %s1950_s29, 64 }
  0x4f   : > { %p1653_p5 = scmp.ne.s32.totalorder %s1950_s29, %s1652_s26  ;;  %p1660_p4 = scmp.lt.s32.totalorder %s1950_s29, %s1950_s29 }
  0x50   : > { %p1661_p10 = scmp.lt.s32.totalorder %s1659_s25, %s1652_s26 }
  0x51   : > { %p1655_p7 = pnand %p1653_p5, %p1960_p8 }
  0x52   : > { %p1662_p11 = por %p1661_p10, %p1660_p4 }
  0x53   : > { %p1656_p9 = pneg %p1655_p7 }
  0x55   : > { %p1663_p12 = pnand %p1662_p11, %p1656_p9 }
  0x57   : > { %1666 = shalt.err (!%p1663_p12)
}
  0x58   : > { %1453 = dma.hbm_to_vmem [thread:$0]  (!%p1944_p6), %s2281_s2, 48, %s1950_s29, [#allocation6]  }
  0x59   : > { %s1838_s9 = smov [#allocation10]   ;;  %s1667_s12 = scalar_lea.hbm %s2284_s5, 1024 }
  0x5a   : > { %s347_s10 = sshll.u32 %s1838_s9, 4  ;;  %p1668_p13 = scmp.ne.s32.totalorder %s2284_s5, %s1667_s12  ;;  %s348_s10 = int_to_ptr.vmem [resolvable:$true] %s347_s10 }
  0x5b   : > { %p1674_p5 = scmp.lt.u32.totalorder %s1667_s12, %s2284_s5 }
  0x5c   : > { %p1670_p0 = pnand %p1668_p13, %p1960_p8 }
  0x5e   : > { %p1671_p2 = pneg %p1670_p0 }
  0x60   : > { %p1676_p7 = pnand %p1674_p5, %p1671_p2 }
  0x62   : > { %1679 = shalt.err (!%p1676_p7)
}
  0x63   : > { %s1680_s29 = scalar_lea.vmem %s348_s10, 1024  ;;  %p1688_p11 = scmp.lt.s32.totalorder %s348_s10, %s348_s10 }
  0x64   : > { %p1681_p9 = scmp.ne.s32.totalorder %s348_s10, %s1680_s29  ;;  %p1689_p12 = scmp.lt.s32.totalorder %s1680_s29, %s1680_s29 }
  0x66   : > { %p1683_p4 = pnand %p1681_p9, %p1960_p8  ;;  %p1690_p1 = por %p1689_p12, %p1688_p11 }
  0x68   : > { %p1684_p10 = pneg %p1683_p4 }
  0x6a   : > { %p1691_p3 = pnand %p1690_p1, %p1684_p10 }
  0x6c   : > { %1694 = shalt.err (!%p1691_p3)
}
  0x6d   : > { %s1839_s26 = smov 64   ;;  %s1840_s25 = smov 4  }
  0x6e   : > { %1459 = dma.hbm_to_vmem [thread:$0]  (!%p1944_p6), %s2284_s5, 1024, %s348_s10, [#allocation9], %s1839_s26, %s1839_s26, %s1840_s25  }
  0x6f   : > { %s1841_s9 = smov [#allocation11]   ;;  %s1695_s13 = scalar_lea.hbm %s2286_s7, 1024 }
  0x70   : > { %s363_s11 = sshll.u32 %s1841_s9, 4  ;;  %p1696_p1 = scmp.ne.s32.totalorder %s2286_s7, %s1695_s13  ;;  %s364_s11 = int_to_ptr.vmem [resolvable:$true] %s363_s11 }
  0x71   : > { %p1702_p0 = scmp.lt.u32.totalorder %s1695_s13, %s2286_s7 }
  0x72   : > { %p1698_p3 = pnand %p1696_p1, %p1960_p8 }
  0x74   : > { %p1699_p13 = pneg %p1698_p3 }
  0x76   : > { %p1704_p2 = pnand %p1702_p0, %p1699_p13 }
  0x78   : > { %1707 = shalt.err (!%p1704_p2)
}
  0x79   : > { %s1708_s10 = scalar_lea.vmem %s364_s11, 1024  ;;  %p1716_p4 = scmp.lt.s32.totalorder %s364_s11, %s364_s11 }
  0x7a   : > { %p1709_p5 = scmp.ne.s32.totalorder %s364_s11, %s1708_s10  ;;  %p1717_p10 = scmp.lt.s32.totalorder %s1708_s10, %s1708_s10 }
  0x7c   : > { %p1711_p7 = pnand %p1709_p5, %p1960_p8  ;;  %p1718_p11 = por %p1717_p10, %p1716_p4 }
  0x7e   : > { %p1712_p9 = pneg %p1711_p7 }
  0x80   : > { %p1719_p12 = pnand %p1718_p11, %p1712_p9 }
  0x82   : > { %1722 = shalt.err (!%p1719_p12)
}
  0x83   : > { %1462 = dma.hbm_to_vmem [thread:$0]  (!%p1944_p6), %s2286_s7, 1024, %s364_s11, [#allocation12], %s1839_s26, %s1839_s26, %s1840_s25  }
  0x84   : > { %s1255_s16 = sadd.s32 4294967294, %s1831_s20   ;;  %s2066_s27 = sadd.s32 1, %s1831_s20  }
  0x85   : > { %s37_s9 = sadd.s32 1, %s1827_s19  ;;  %s34_s30 = ssub.s32 %s1831_s20, %s2066_s27 }
  0x86   : > { %p44_p8 = scmp.ne.s32.totalorder %s1827_s19, %s1823_s18  ;;  %p35_p1 = scmp.eq.s32.totalorder %s34_s30, 0 }
  0x87   : > { %p45_p3 = scmp.eq.s32.totalorder %s1831_s20, 0  ;;  %p50_p13 = scmp.ne.s32.totalorder %s1823_s18, %s1819_s17 }
  0x88   : > { %p284_p0 = scmp.eq.s32.totalorder %s1928_s23, 1  ;;  %p2304_p5 = scmp.eq.s32.totalorder %s1928_s23, 0 }
  0x89   : > { %s2078_s12 = scalar_select %p35_p1, %s1827_s19, %s37_s9  }
  0x8a   : > { %p46_p2 = por %p45_p3, %p44_p8  ;;  %p2082_p7 = por %p2304_p5, %p50_p13 }
  0x8b   : > { %p2086_p6 = por %p284_p0, %p44_p8  ;;  %p290_p9 = scmp.eq.s32.totalorder %s1255_s16, 1 }
  0x8c   : > { %p1476_p4 = scmp.lt.s32.totalorder %s1831_s20, 2  ;;  %s386_s25 = sand.u32 1, %s1827_s19  }
  0x8d   : > { %s2306_s26 = scalar_select %p2086_p6, 1, 0 }
  0x8e   : > { %p2092_p10 = por %p290_p9, %p50_p13  ;;  %s1263_s14 = sshll.u32 %s386_s25, 3 }
  0x8f   : > { %s1264_s15 = sshll.u32 %s1831_s20, 7  ;;  %s2308_s0 = sld [smem:[#allocation19_spill]] }
  0x90   : > { %s2307_s11 = scalar_select %p2092_p10, 1, 0 }
  0x91   : > { %s390_s28 = scalar_lea.vmem [#allocation2], %s1263_s14  ;;  %p2102_p11 = pnand %p1476_p4, %p46_p2 }
  0x92   : > { %s397_s22 = sshll.u32 %s390_s28, 4  ;;  %s387_s9 = scalar_lea.sflag [#allocation3], %s386_s25  ;;  %s2106_s22 = int_to_ptr.vmem [resolvable:$true] %s397_s22 }
  0x93   : > { %p1725_p8 = pneg %p2102_p11 }
  0x95   : > { %s2100_s10 = scalar_lea.hbm %s2308_s0, %s1264_s15  ;;  %s1728_s21 = scalar_lea.hbm %s2308_s0, 256 }
  0x96   : > { %s1723_s30 = scalar_lea.hbm %s2100_s10, 128  ;;  %p1729_p13 = scmp.lt.u32.totalorder %s2100_s10, %s2308_s0 }
  0x97   : > { %p1724_p12 = scmp.ne.s32.totalorder %s2100_s10, %s1723_s30  ;;  %p1730_p0 = scmp.lt.u32.totalorder %s1728_s21, %s1723_s30 }
  0x98   : > { %p1732_p5 = scmp.lt.u32.totalorder %s1723_s30, %s2100_s10 }
  0x99   : > { %p1726_p1 = pnand %p1725_p8, %p1724_p12  ;;  %p1731_p2 = por %p1730_p0, %p1729_p13 }
  0x9b   : > { %p1727_p3 = pneg %p1726_p1  ;;  %p1733_p9 = por %p1732_p5, %p1731_p2 }
  0x9d   : > { %p1734_p4 = pnand %p1733_p9, %p1727_p3 }
  0x9f   : > { %1737 = shalt.err (!%p1734_p4)
}
  0xa0   : > { %s1738_s25 = scalar_lea.vmem %s2106_s22, 128  ;;  %s1842_s15 = smov [#allocation2]  }
  0xa1   : > { %p1739_p12 = scmp.ne.s32.totalorder %s2106_s22, %s1738_s25  ;;  %s1743_s14 = sshll.u32 %s1842_s15, 4  ;;  %s1744_s14 = int_to_ptr.vmem [resolvable:$false] %s1743_s14 }
  0xa2   : > { %s1745_s29 = scalar_lea.vmem %s1744_s14, 256  ;;  %p1746_p6 = scmp.lt.s32.totalorder %s2106_s22, %s1744_s14 }
  0xa3   : > { %p1741_p1 = pnand %p1739_p12, %p1725_p8  ;;  %p1747_p13 = scmp.lt.s32.totalorder %s1745_s29, %s1738_s25 }
  0xa5   : > { %p1742_p10 = pneg %p1741_p1  ;;  %p1748_p0 = por %p1747_p13, %p1746_p6 }
  0xa7   : > { %p1749_p2 = pnand %p1748_p0, %p1742_p10 }
  0xa9   : > { %1752 = shalt.err (!%p1749_p2)
}
  0xaa   : > { %1466 = dma.hbm_to_vmem [thread:$0]  (!%p2102_p11), %s2100_s10, 128, %s2106_s22, %s387_s9  }
  0xab   : > { %p2310_p3 = scmp.ne.s32.totalorder %s2300_s24, 0 }
  0xac   : > { %s2136_s30 = sand.u32 (!%p2310_p3), 1, %s1823_s18  }
  0xad   : > { %406 = sbr.rel (%p2310_p3) target bundleno = 2311 (0x907), region = 64  ;;  %s1266_s21 = sshll.u32 (!%p2310_p3), %s2136_s30, 3 }
  0xae   : > { %s409_s28 = scalar_lea.sflag (!%p2310_p3), [#allocation3], %s2136_s30  ;;  %s2142_s25 = scalar_lea.vmem (!%p2310_p3), [#allocation2], %s1266_s21 }
  0xb4   : > { %1798 = dma.done.wait (%p2082_p7), %s409_s28, 128  }
  0xb5   : > { %1800 = vsyncadd (%p2082_p7), %s409_s28, 4294967168  ;;  %p2311_p6 = scmp.eq.s32.totalorder %s1928_s23, 0 }
  0xb7   : > { %1802 = dma.done.wait (%p2311_p6), [#allocation6], 3120   ;;  %p2312_p10 = pmov %p2311_p6 }
  0xb8   : > { %p2313_p11 = pmov %p2311_p6 }
  0xb9   : > { %1804 = vsyncadd (%p2312_p10), [#allocation6], 4294964176 }
  0xba   : > { %1806 = dma.done.wait (%p2313_p11), [#allocation9], 1152   ;;  %p2314_p8 = pmov %p2311_p6 }
  0xbb   : > { %p2315_p5 = pmov %p2311_p6 }
  0xbc   : > { %1808 = vsyncadd (%p2314_p8), [#allocation9], 4294966144 }
  0xbd   : > { %1810 = dma.done.wait (%p2315_p5), [#allocation12], 1024   ;;  %p2316_p9 = pmov %p2315_p5 }
  0xbe   : > { %v1843_v0 = vmov 0   ;;  %v1527_v1 = vld [vmem:[#allocation5 + $0x4] ss:$12 sps:$4 sm:$0xff]   ;;  %v1529_v2 = vld [vmem:[#allocation5] ss:$12 sps:$4 sm:$0xff]   ;;  %v1844_v19 = vmov 0.0   ;;  %v508_v20 = vlaneseq }
  0xbf   : > { %1812 = vsyncadd (%p2316_p9), [#allocation12], 4294966272  ;;  %683 = vmatprep.mubr.bf16.mxu0 %v1843_v0  ;;  %651 = vmatprep.subr.bf16.mxu0 %v1527_v1  ;;  %v1530_v3 = vld [vmem:[#allocation5 + $0x1c] ss:$12 sps:$4 sm:$0xff]   ;;  %v1532_v4 = vld [vmem:[#allocation5 + $0x18] ss:$12 sps:$4 sm:$0xff]  }
  0xc0   : > { %652 = vmatpush1.bf16.msra.mxu0 %v1529_v2  ;;  %v1533_v5 = vld [vmem:[#allocation5 + $0x34] ss:$12 sps:$4 sm:$0xff]   ;;  %v1535_v6 = vld [vmem:[#allocation5 + $0x30] ss:$12 sps:$4 sm:$0xff]   ;;  %v1536_v7 = vld [vmem:[#allocation5 + $0x4c] ss:$12 sps:$4 sm:$0xff]   ;;  %1351 = vmatprep.subr.bf16.mxu1 %v1844_v19 }
  0xc1   : > { %653 = vmatprep.subr.bf16.mxu0 %v1530_v3  ;;  %v1538_v8 = vld [vmem:[#allocation5 + $0x48] ss:$12 sps:$4 sm:$0xff]   ;;  %v1539_v9 = vld [vmem:[#allocation5 + $0x64] ss:$12 sps:$4 sm:$0xff]   ;;  %v1541_v10 = vld [vmem:[#allocation5 + $0x60] ss:$12 sps:$4 sm:$0xff]  }
  0xc2   : > { %v1542_v11 = vld [vmem:[#allocation5 + $0x7c] ss:$12 sps:$4 sm:$0xff]   ;;  %v1544_v12 = vld [vmem:[#allocation5 + $0x78] ss:$12 sps:$4 sm:$0xff]   ;;  %v1545_v13 = vld [vmem:[#allocation5 + $0x94] ss:$12 sps:$4 sm:$0xff]  }
  0xc3   : > { %v1547_v14 = vld [vmem:[#allocation5 + $0x90] ss:$12 sps:$4 sm:$0xff]   ;;  %v1548_v15 = vld [vmem:[#allocation5 + $0xac] ss:$12 sps:$4 sm:$0xff]   ;;  %v1550_v16 = vld [vmem:[#allocation5 + $0xa8] ss:$12 sps:$4 sm:$0xff]  }
  0xc4   : > { %654 = vmatpush1.bf16.msra.mxu0 %v1532_v4  ;;  %v2161_v17 = vld [vmem:[%s2142_s25] sm:$0xff]  ;;  %vm1845_vm0 = vmmov 0   ;;  %v509_v21 = vshrl.u32 %v508_v20, 7  ;;  %v506_v23 = vld [vmem:[#allocation7] sm:$0x7]  ;;  %vm775_vm1 = vcmask 64512  }
  0xc5   : > { %655 = vmatprep.subr.bf16.mxu0 %v1533_v5  ;;  %v473_v18 = vpack.c.bf16 %v2161_v17, %v2161_v17  ;;  %1367 = vmatprep.mubr.msk.bf16.mxu1 %vm1845_vm0, %v1844_v19  ;;  %v1551_v35 = vld [vmem:[#allocation5 + $0x8] ss:$12 sps:$4 sm:$0xff]   ;;  %v1552_v36 = vld [vmem:[#allocation5 + $0x20] ss:$12 sps:$4 sm:$0xff]   ;;  %v1553_v37 = vld [vmem:[#allocation5 + $0x38] ss:$12 sps:$4 sm:$0xff]  }
  0xc6   : > { %v514_v22 = vsub.s32 1, %v509_v21  ;;  %v510_v25 = vsub.s32 0, %v509_v21  ;;  %1352 = vmatpush3.bf16.msra.mxu1 %v1551_v35  ;;  %v1554_v38 = vld [vmem:[#allocation5 + $0x50] ss:$12 sps:$4 sm:$0xff]   ;;  %v1555_v39 = vld [vmem:[#allocation5 + $0x68] ss:$12 sps:$4 sm:$0xff]  }
  0xc7   : > { %1353 = vmatprep.subr.bf16.mxu1 %v1844_v19  ;;  %v1556_v40 = vld [vmem:[#allocation5 + $0x80] ss:$12 sps:$4 sm:$0xff]   ;;  %v1557_v41 = vld [vmem:[#allocation5 + $0x98] ss:$12 sps:$4 sm:$0xff]   ;;  %v1558_v42 = vld [vmem:[#allocation5 + $0xb0] ss:$12 sps:$4 sm:$0xff]  }
  0xc8   : > { %656 = vmatpush1.bf16.msra.mxu0 %v1535_v6  ;;  %v515_v24 = vrot.slane %v506_v23, %v514_v22  ;;  %v511_v30 = vrot.slane %v506_v23, %v510_v25  ;;  %v518_v48 = vsub.s32 2, %v509_v21  ;;  %vm791_vm2 = vcmask 1043456   ;;  %v1559_v21 = vld [vmem:[#allocation10] sm:$0xff]   ;;  %v1560_v22 = vld [vmem:[#allocation10 + $0x8] sm:$0xff]   ;;  %s2317_s29 = sld [smem:[#allocation21_spill]]  ;;  %s2318_s24 = sld [smem:[#allocation22_spill]] }
  0xc9   : > { %657 = vmatprep.subr.bf16.mxu0 %v1536_v7  ;;  %v1564_v25 = vld [vmem:[#allocation10 + $0x28] sm:$0xff]   ;;  %s1317_s13 = sshll.u32 %s1928_s23, 7  ;;  %s470_s10 = scalar_lea.vmem [#allocation13], %s1266_s21 }
  0xca   : > { %1354 = vmatpush3.bf16.msra.mxu1 %v1552_v36  ;;  %v519_v49 = vrot.slane %v506_v23, %v518_v48  ;;  %v1562_v23 = vld [vmem:[#allocation10 + $0x18] sm:$0xff]   ;;  %s1137_s22 = sshll.u32 %s470_s10, 4  ;;  %s2319_s0 = sld [smem:[#allocation23_spill]]  ;;  %s2237_s22 = int_to_ptr.vmem [resolvable:$true] %s1137_s22 }
  0xcb   : > { %1355 = vmatprep.subr.bf16.mxu1 %v1844_v19  ;;  %s1124_s15 = scalar_lea.sflag [#allocation4], %s2136_s30  ;;  %s1753_s14 = scalar_lea.vmem %s2237_s22, 128 }
  0xcc   : > { %658 = vmatpush1.bf16.msra.mxu0 %v1538_v8  ;;  %p1754_p7 = scmp.ne.s32.totalorder %s2237_s22, %s1753_s14  ;;  %p2320_p4 = scmp.ne.s32.totalorder %s2306_s26, 0 }
  0xcd   : > { %659 = vmatprep.subr.bf16.mxu0 %v1539_v9  ;;  %s1846_s23 = smov [#allocation13]  }
  0xce   : > { %1356 = vmatpush3.bf16.msra.mxu1 %v1553_v37  ;;  %p1755_p12 = pnand %p1754_p7, %p2320_p4  ;;  %s1757_s21 = sshll.u32 %s1846_s23, 4  ;;  %s1758_s21 = int_to_ptr.vmem [resolvable:$false] %s1757_s21 }
  0xcf   : > { %1357 = vmatprep.subr.bf16.mxu1 %v1844_v19  ;;  %p1760_p13 = scmp.lt.s32.totalorder %s2237_s22, %s1758_s21 }
  0xd0   : > { %660 = vmatpush1.bf16.msra.mxu0 %v1541_v10  ;;  %s2235_s1 = scalar_lea.hbm %s2319_s0, %s1317_s13  ;;  %p1756_p1 = pneg %p1755_p12 }
  0xd1   : > { %661 = vmatprep.subr.bf16.mxu0 %v1542_v11 }
  0xd2   : > { %1358 = vmatpush3.bf16.msra.mxu1 %v1554_v38 }
  0xd3   : > { %1359 = vmatprep.subr.bf16.mxu1 %v1844_v19 }
  0xd4   : > { %662 = vmatpush1.bf16.msra.mxu0 %v1544_v12 }
  0xd5   : > { %663 = vmatprep.subr.bf16.mxu0 %v1545_v13  ;;  %v2193_v13 = vand.u32 127, %v508_v20  ;;  %v1561_v20 = vld [vmem:[#allocation10 + $0x10] sm:$0xff]  }
  0xd6   : > { %1360 = vmatpush3.bf16.msra.mxu1 %v1555_v39 }
  0xd7   : > { %1361 = vmatprep.subr.bf16.mxu1 %v1844_v19  ;;  %vm849_vm3 = vcmp.lt.s32.totalorder %v2193_v13, 32  ;;  %v1094_v13 = vld [vmem:[%s2317_s29] sm:$0xff]  ;;  %s1759_s29 = scalar_lea.vmem %s1758_s21, 256 }
  0xd8   : > { %664 = vmatpush1.bf16.msra.mxu0 %v1547_v14  ;;  %p1761_p0 = scmp.lt.s32.totalorder %s1759_s29, %s1753_s14 }
  0xd9   : > { %665 = vmatprep.subr.bf16.mxu0 %v1548_v15 }
  0xda   : > { %1362 = vmatpush3.bf16.msra.mxu1 %v1556_v40  ;;  %p1762_p2 = por %p1761_p0, %p1760_p13 }
  0xdb   : > { %1363 = vmatprep.subr.bf16.mxu1 %v1844_v19 }
  0xdc   : > { %666 = vmatpush1.bf16.msra.mxu0 %v1550_v16  ;;  %p1763_p3 = pnand %p1762_p2, %p1756_p1 }
  0xdd   : > { %1371 = vmatprep.subr.bf16.mxu0 %v1844_v19 }
  0xde   : > { %1364 = vmatpush3.bf16.msra.mxu1 %v1557_v41 }
  0xdf   : > { %684 = vmatmul.mubr.bf16.vlgmr.msra.gmra.mrb[0].mxu0 %v473_v18  ;;  %1365 = vmatprep.subr.bf16.mxu1 %v1844_v19 }
  0xe0   : > { %1373 = vmatprep.mubr.msk.bf16.mxu0 %vm1845_vm0, %v1844_v19 }
  0xe2   : > { %1366 = vmatpush3.bf16.msra.mxu1 %v1558_v42 }
  0xe3   : > { %1377 = vmatprep.subr.bf16.mxu1 %v1844_v19 }
  0xe5   : > { %1368 = vmatmul.mubr.bf16.vlgmr.msra.gmra.mrb[0].mxu1 %v473_v18 }
  0xe6   : > { %1379 = vmatprep.mubr.msk.bf16.mxu1 %vm1845_vm0, %v1844_v19 }
 0x1b2   : > { %v685_v26 = vpop.f32.mrb[0].mxu0 }
 0x1b3   : > { %v687_v27 = vpop.f32.mrb[1].mxu0  ;;  %v686_v33 = vadd.f32 %v685_v26, %v511_v30  ;;  %v1565_v26 = vld [vmem:[#allocation10 + $0x30] sm:$0xff]  }
 0x1b4   : > { %v688_v28 = vadd.f32 %v687_v27, %v515_v24  ;;  %v689_v29 = vpop.f32.mrb[2].mxu0  ;;  %v1563_v24 = vld [vmem:[#allocation10 + $0x20] sm:$0xff]   ;;  %v1566_v27 = vld [vmem:[#allocation10 + $0x38] sm:$0xff]   ;;  %v1569_v30 = vld [vmem:[#allocation11 + $0x10] sm:$0xff]  }
 0x1b5   : > { %v690_v31 = vpop.f32.mrb[3].mxu0  ;;  %v732_v34 = vpack.c.bf16 %v686_v33, %v686_v33  ;;  %v1568_v29 = vld [vmem:[#allocation11 + $0x8] sm:$0xff]  }
 0x1b6   : > { %v733_v32 = vpack.c.bf16 %v688_v28, %v688_v28  ;;  %v1567_v28 = vld [vmem:[#allocation11] sm:$0xff]   ;;  %v1570_v31 = vld [vmem:[#allocation11 + $0x18] sm:$0xff]   ;;  %v1572_v33 = vld [vmem:[#allocation11 + $0x28] sm:$0xff]  }
 0x1b8   : > { %1372 = vmatpush3.bf16.xpose.msra.mxu0 %v733_v32  ;;  %v726_v50 = vpop.f32.mrb[0].mxu1  ;;  %v1571_v32 = vld [vmem:[#allocation11 + $0x20] sm:$0xff]  }
 0x1b9   : > { %1383 = vmatprep.subr.bf16.mxu0 %v1844_v19  ;;  %v727_v51 = vadd.f32 %v726_v50, %v519_v49  ;;  %v1369_v52 = vpop.f32.mrb[1].mxu1  ;;  %v1573_v50 = vld [vmem:[#allocation11 + $0x30] sm:$0xff]  }
 0x1ba   : > { %v729_v53 = vpop.f32.mrb[2].mxu1  ;;  %v1298_v52 = vld [vmem:[%s2285_s6] ss:$0 sm:$0xff] }
 0x1bb   : > { %v734_v54 = vpack.c.bf16 %v727_v51, %v727_v51  ;;  %v1370_v55 = vpop.f32.mrb[3].mxu1  ;;  %v1574_v51 = vld [vmem:[#allocation11 + $0x38] sm:$0xff]  }
 0x1bd   : > { %v793_v56 = vsel %vm791_vm2, %v734_v54, 0 }
 0x1be   : > { %1378 = vmatpush3.bf16.msra.mxu1 %v793_v56 }
 0x1bf   : > { %1374 = vmatmul.mubr.bf16.vlgmr.msra.gmra.mrb[4].mxu0 %v732_v34  ;;  %1403 = vmatprep.subr.bf16.mxu1 %v1844_v19 }
 0x1c0   : > { %1399 = vmatprep.mubr.msk.bf16.mxu0 %vm1845_vm0, %v1844_v19  ;;  %1384 = vmatpush3.bf16.msra.mxu0 %v1559_v21 }
 0x1c1   : > { %1385 = vmatprep.subr.bf16.mxu0 %v1844_v19 }
 0x1c4   : > { %1386 = vmatpush3.bf16.msra.mxu0 %v1560_v22 }
 0x1c5   : > { %1387 = vmatprep.subr.bf16.mxu0 %v1844_v19 }
 0x1c8   : > { %1388 = vmatpush3.bf16.msra.mxu0 %v1561_v20 }
 0x1c9   : > { %1389 = vmatprep.subr.bf16.mxu0 %v1844_v19 }
 0x1cc   : > { %1390 = vmatpush3.bf16.msra.mxu0 %v1562_v23 }
 0x1cd   : > { %1391 = vmatprep.subr.bf16.mxu0 %v1844_v19 }
 0x1d0   : > { %1392 = vmatpush3.bf16.msra.mxu0 %v1563_v24 }
 0x1d1   : > { %1393 = vmatprep.subr.bf16.mxu0 %v1844_v19 }
 0x1d4   : > { %1394 = vmatpush3.bf16.msra.mxu0 %v1564_v25 }
 0x1d5   : > { %1395 = vmatprep.subr.bf16.mxu0 %v1844_v19 }
 0x1d8   : > { %1396 = vmatpush3.bf16.msra.mxu0 %v1565_v26  ;;  %v1095_v26 = vld [vmem:[%s2318_s24] sm:$0xff] }
 0x1d9   : > { %1397 = vmatprep.subr.bf16.mxu0 %v1844_v19 }
 0x1dc   : > { %1398 = vmatpush3.bf16.msra.mxu0 %v1566_v27 }
 0x292   : > { %v769_v43 = vpop.f32.mrb[4].mxu0 }
 0x293   : > { %v1375_v44 = vpop.f32.mrb[5].mxu0  ;;  %v776_v45 = vsel %vm775_vm1, %v769_v43, -inf }
 0x294   : > { %777 = vmax.xlane.f32.xlu0 %v776_v45  ;;  %v772_v46 = vpop.f32.mrb[6].mxu0  ;;  %v835_v44 = vld [vmem:[%s2282_s3] sm:$0xff] }
 0x295   : > { %v1376_v47 = vpop.f32.mrb[7].mxu0  ;;  %v836_v46 = vld [vmem:[#allocation8] sm:$0xff] }
 0x321   : > { %v778_v57 = vpop.xlane.xlu0 %777 }
 0x322   : > { %v779_v58 = vsub.f32 %v769_v43, %v778_v57 }
 0x324   : > { %v780_v59 = vmul.f32 1.442695, %v779_v58 }
 0x326   : > { %1575 = vpow2.f32 %v780_v59 }
 0x330   : > { %v1576_v60 = vpop.eup %1575 }
 0x331   : > { %v782_v61 = vsel %vm775_vm1, %v1576_v60, 0.0 }
 0x332   : > { %783 = vadd.xlane.f32.xlu0 %v782_v61 }
 0x3bf   : > { %v784_v62 = vpop.xlane.xlu0 %783 }
 0x3c0   : > { %1577 = vrcp.f32 %v784_v62 }
 0x3ca   : > { %v1578_v63 = vpop.eup %1577 }
 0x3cb   : > { %v786_v0 = vmul.f32 %v1578_v63, %v1576_v60  ;;  %v1307_v60 = vld [vmem:[%s2287_s8] ss:$0 sm:$0xff] }
 0x3cd   : > { %v787_v1 = vpack.c.bf16 %v786_v0, %v786_v0 }
 0x3cf   : > { %1380 = vmatmul.mubr.msk.bf16.vlgmr.msra.gmra.mrb[4].mxu1 %vm775_vm1, %v787_v1 }
 0x3d0   : > { %1419 = vmatprep.mubr.msk.bf16.mxu1 %vm1845_vm0, %v1844_v19  ;;  %1404 = vmatpush3.bf16.msra.mxu1 %v1567_v28 }
 0x3d1   : > { %1405 = vmatprep.subr.bf16.mxu1 %v1844_v19 }
 0x3d4   : > { %1406 = vmatpush3.bf16.msra.mxu1 %v1568_v29 }
 0x3d5   : > { %1407 = vmatprep.subr.bf16.mxu1 %v1844_v19 }
 0x3d8   : > { %1408 = vmatpush3.bf16.msra.mxu1 %v1569_v30 }
 0x3d9   : > { %1409 = vmatprep.subr.bf16.mxu1 %v1844_v19 }
 0x3dc   : > { %1410 = vmatpush3.bf16.msra.mxu1 %v1570_v31 }
 0x3dd   : > { %1411 = vmatprep.subr.bf16.mxu1 %v1844_v19 }
 0x3e0   : > { %1412 = vmatpush3.bf16.msra.mxu1 %v1571_v32 }
 0x3e1   : > { %1413 = vmatprep.subr.bf16.mxu1 %v1844_v19 }
 0x3e4   : > { %1414 = vmatpush3.bf16.msra.mxu1 %v1572_v33 }
 0x3e5   : > { %1415 = vmatprep.subr.bf16.mxu1 %v1844_v19 }
 0x3e8   : > { %1416 = vmatpush3.bf16.msra.mxu1 %v1573_v50 }
 0x3e9   : > { %1417 = vmatprep.subr.bf16.mxu1 %v1844_v19 }
 0x3ec   : > { %1418 = vmatpush3.bf16.msra.mxu1 %v1574_v51 }
 0x4a2   : > { %v829_v2 = vpop.f32.mrb[4].mxu1 }
 0x4a3   : > { %v830_v3 = vadd.f32 %v829_v2, %v2161_v17  ;;  %v1381_v4 = vpop.f32.mrb[5].mxu1 }
 0x4a4   : > { %v832_v5 = vpop.f32.mrb[6].mxu1 }
 0x4a5   : > { %837 = vadd.xlane.f32.xlu1 %v830_v3  ;;  %v1382_v6 = vpop.f32.mrb[7].mxu1 }
 0x532   : > { %v838_v7 = vpop.xlane.xlu1 %837 }
 0x533   : > { %v839_v8 = vrot.slane %v838_v7, 4 }
 0x535   : > { %v840_v9 = vadd.f32 %v839_v8, %v838_v7 }
 0x537   : > { %v841_v10 = vrot.slane %v840_v9, 2 }
 0x539   : > { %v842_v11 = vadd.f32 %v841_v10, %v840_v9 }
 0x53b   : > { %v843_v12 = vrot.slane %v842_v11, 1 }
 0x53d   : > { %v844_v14 = vadd.f32 %v843_v12, %v842_v11 }
 0x53f   : > { %v845_v15 = vmul.f32 0.00390625, %v844_v14 }
 0x541   : > { %v846_v16 = vsub.f32 %v830_v3, %v845_v15 }
 0x543   : > { %v852_v17 = vsel %vm849_vm3, %v846_v16, 0.0 }
 0x544   : > { %v853_v18 = vmul.f32 %v852_v17, %v852_v17 }
 0x546   : > { %854 = vadd.xlane.f32.xlu1 %v853_v18 }
 0x5d3   : > { %v855_v34 = vpop.xlane.xlu1 %854 }
 0x5d4   : > { %v856_v35 = vrot.slane %v855_v34, 4 }
 0x5d6   : > { %v857_v36 = vadd.f32 %v856_v35, %v855_v34 }
 0x5d8   : > { %v858_v37 = vrot.slane %v857_v36, 2 }
 0x5da   : > { %v859_v38 = vadd.f32 %v858_v37, %v857_v36 }
 0x5dc   : > { %v860_v39 = vrot.slane %v859_v38, 1 }
 0x5de   : > { %v861_v40 = vadd.f32 %v860_v39, %v859_v38 }
 0x5e0   : > { %v862_v41 = vmul.f32 0.00390625, %v861_v40 }
 0x5e2   : > { %v863_v42 = vadd.f32 1e-08, %v862_v41 }
 0x5e4   : > { %1579 = vrsqrt.f32 %v863_v42 }
 0x5ee   : > { %v1580_v43 = vpop.eup %1579 }
 0x5ef   : > { %v865_v45 = vmul.f32 %v1580_v43, %v852_v17 }
 0x5f1   : > { %v866_v47 = vmul.f32 %v865_v45, %v835_v44 }
 0x5f3   : > { %v867_v48 = vadd.f32 %v866_v47, %v836_v46 }
 0x5f5   : > { %v868_v49 = vpack.c.bf16 %v867_v48, %v867_v48 }
 0x5f7   : > { %1400 = vmatmul.mubr.bf16.vlgmr.msra.gmra.mrb[8].mxu0 %v868_v49 }
 0x6ca   : > { %v974_v53 = vpop.f32.mrb[8].mxu0 }
 0x6cb   : > { %v975_v54 = vadd.f32 %v1298_v52, %v974_v53  ;;  %v1401_v55 = vpop.f32.mrb[9].mxu0 }
 0x6cc   : > { %v977_v56 = vpop.f32.mrb[10].mxu0 }
 0x6cd   : > { %v980_v57 = vmax.f32 %v975_v54, 0.0  ;;  %v1402_v58 = vpop.f32.mrb[11].mxu0 }
 0x6cf   : > { %v981_v59 = vpack.c.bf16 %v980_v57, %v980_v57 }
 0x6d1   : > { %1420 = vmatmul.mubr.bf16.vlgmr.msra.gmra.mrb[8].mxu1 %v981_v59 }
 0x7a4   : > { %v1087_v61 = vpop.f32.mrb[8].mxu1 }
 0x7a5   : > { %v1088_v19 = vadd.f32 %v1307_v60, %v1087_v61  ;;  %v1421_v62 = vpop.f32.mrb[9].mxu1 }
 0x7a6   : > { %v1090_v63 = vpop.f32.mrb[10].mxu1 }
 0x7a7   : > { %v1422_v0 = vpop.f32.mrb[11].mxu1  ;;  %v1093_v1 = vadd.f32 %v1088_v19, %v867_v48 }
 0x7a9   : > { %1096 = vadd.xlane.f32.xlu0 %v1093_v1 }
 0x836   : > { %v1097_v2 = vpop.xlane.xlu0 %1096 }
 0x837   : > { %v1098_v3 = vrot.slane %v1097_v2, 4 }
 0x839   : > { %v1099_v4 = vadd.f32 %v1098_v3, %v1097_v2 }
 0x83b   : > { %v1100_v5 = vrot.slane %v1099_v4, 2 }
 0x83d   : > { %v1101_v6 = vadd.f32 %v1100_v5, %v1099_v4 }
 0x83f   : > { %v1102_v7 = vrot.slane %v1101_v6, 1 }
 0x841   : > { %v1103_v8 = vadd.f32 %v1102_v7, %v1101_v6 }
 0x843   : > { %v1104_v9 = vmul.f32 0.00390625, %v1103_v8 }
 0x845   : > { %v1105_v10 = vsub.f32 %v1093_v1, %v1104_v9 }
 0x847   : > { %v1106_v11 = vsel %vm849_vm3, %v1105_v10, 0.0 }
 0x848   : > { %v1107_v12 = vmul.f32 %v1106_v11, %v1106_v11 }
 0x84a   : > { %1108 = vadd.xlane.f32.xlu1 %v1107_v12 }
 0x8d7   : > { %v1109_v14 = vpop.xlane.xlu1 %1108 }
 0x8d8   : > { %v1110_v15 = vrot.slane %v1109_v14, 4 }
 0x8da   : > { %v1111_v16 = vadd.f32 %v1110_v15, %v1109_v14 }
 0x8dc   : > { %v1112_v17 = vrot.slane %v1111_v16, 2 }
 0x8de   : > { %v1113_v18 = vadd.f32 %v1112_v17, %v1111_v16 }
 0x8e0   : > { %v1114_v21 = vrot.slane %v1113_v18, 1 }
 0x8e2   : > { %v1115_v22 = vadd.f32 %v1114_v21, %v1113_v18 }
 0x8e4   : > { %v1116_v20 = vmul.f32 0.00390625, %v1115_v22 }
 0x8e6   : > { %v1117_v23 = vadd.f32 1e-08, %v1116_v20 }
 0x8e8   : > { %1581 = vrsqrt.f32 %v1117_v23 }
 0x8f2   : > { %v1582_v24 = vpop.eup %1581 }
 0x8f3   : > { %v1119_v25 = vmul.f32 %v1582_v24, %v1106_v11 }
 0x8f5   : > { %v1120_v27 = vmul.f32 %v1119_v25, %v1094_v13 }
 0x8f7   : > { %v1121_v28 = vadd.f32 %v1120_v27, %v1095_v26 }
 0x8f9   : > { %1122 = vst [vmem:[%s470_s10] sm:$0xff] %v1121_v28 }
 0x8fa   : > { %1766 = shalt.err (!%p1763_p3)
}
 0x8fb   : > { %s1767_s30 = scalar_lea.hbm %s2235_s1, 128  ;;  %s1771_s24 = scalar_lea.hbm %s2319_s0, 256 }
 0x8fc   : > { %p1768_p6 = scmp.ne.s32.totalorder %s2235_s1, %s1767_s30  ;;  %p1772_p8 = scmp.lt.u32.totalorder %s2235_s1, %s2319_s0 }
 0x8fd   : > { %p1773_p5 = scmp.lt.u32.totalorder %s1771_s24, %s1767_s30  ;;  %p1775_p7 = scmp.lt.u32.totalorder %s1767_s30, %s2235_s1 }
 0x8fe   : > { %p1769_p10 = pnand %p1768_p6, %p2320_p4 }
 0x8ff   : > { %p1774_p9 = por %p1773_p5, %p1772_p8 }
 0x900   : > { %p1770_p11 = pneg %p1769_p10 }
 0x901   : > { %p1776_p12 = por %p1775_p7, %p1774_p9 }
 0x903   : > { %p1777_p1 = pnand %p1776_p12, %p1770_p11 }
 0x905   : > { %1780 = shalt.err (!%p1777_p1)
}
 0x906   : > { %1445 = dma.vmem_to_hbm [thread:$0]  (%p2320_p4), %s2237_s22, 128, %s2235_s1, %s1124_s15  }
 0x907 PF: > { %s1149_s16 = sand.u32 1, %s1819_s17   ;;  %p2321_p13 = scmp.ne.s32.totalorder %s2307_s11, 0 }
 0x908   : > { %p2322_p0 = scmp.ge.s32.totalorder %s1831_s20, 2  ;;  %s1150_s9 = scalar_lea.sflag [#allocation4], %s1149_s16 }
 0x90a   : > { %p1468_p2 = pnand %p2322_p0, %p2321_p13 }
 0x90c   : > { %1814 = dma.done.wait (!%p1468_p2), %s1150_s9, 128  }
 0x90d   : > { %1816 = vsyncadd (!%p1468_p2), %s1150_s9, 4294967168  ;;  %p27_p3 = scmp.ge.s32.totalorder %s2066_s27, 4   ;;  %s2323_s17 = smov %s1823_s18 }
 0x90e   : > { %s2324_s18 = smov %s1827_s19  ;;  %s2325_s19 = smov %s2078_s12 }
 0x90f   : > { %s2326_s20 = smov %s2066_s27  ;;  %29 = sbr.rel (!%p27_p3) target bundleno = 14 (0xe), region = 129 }
 0x916   :  { %1155 = vsyncpa [#allocation3], 1 }
 0x917   :  { %1157 = vsyncpa [#allocation3 + $0x1], 1 }
 0x918   :  { %1158 = vsyncpa [#allocation6], 1 }
 0x919   :  { %1159 = vsyncpa [#allocation9], 1 }
 0x91a   :  { %1160 = vsyncpa [#allocation12], 1 }
 0x91b   :  { %1161 = vsyncpa [#allocation4], 1 }
 0x91c   :  { %1163 = vsyncpa [#allocation4 + $0x1], 1 }

</bundles_post_ra>
